<compile_context>
chip_gen: v7x
topology: tpu7x:2x2x1
jax: 0.10.0
libtpu: 0.0.40
codegen_flags: <defaults>
</compile_context>

<pallas_src>
import functools

import jax
import jax.numpy as jnp
from jax.experimental import pallas as pl
from jax.experimental.pallas import tpu as pltpu


# ----------------------------------------------------------------------------
# In-kernel helper: FinalTanh-style vector field  Linear -> relu -> Linear -> tanh
# ----------------------------------------------------------------------------
def _mlp(x, w1, b1, w2, b2):
    h = jnp.maximum(jnp.dot(x, w1, preferred_element_type=jnp.float32) + b1, 0.0)
    return jnp.tanh(jnp.dot(h, w2, preferred_element_type=jnp.float32) + b2)


# ----------------------------------------------------------------------------
# Single fused kernel: whole forward pass in one invocation (no grid).
# ----------------------------------------------------------------------------
def fused_forward_kernel(dts_ref, dtf_ref, fidx_ref, x0_ref, dxdt_ref,
                         dxt_ref, fold_ref,
                         iw_ref, ib_ref, fcw_ref, fcb_ref, lw_ref, lb_ref,
                         fw1_ref, fb1_ref, fw2_ref, fb2_ref,
                         ffw1_ref, ffb1_ref, ffw2_ref, ffb2_ref,
                         gw1_ref, gb1_ref, gw2_ref, gb2_ref,
                         pred_ref, reg_ref, *, ke_coef):
    n_steps = dxdt_ref.shape[0]          # encoder Euler steps (T - 1)
    output_time = pred_ref.shape[0]      # forecast Euler steps

    fold = fold_ref[...]                 # (C*H, H) constant fold matrix
    fidx = fidx_ref[...]                 # (B, 1) int32 final indices

    # --- z0 = initial_network(X(t0)) -----------------------------------------
    z0 = (jnp.dot(x0_ref[...], iw_ref[...], preferred_element_type=jnp.float32)
          + ib_ref[...])                 # (B, H)
    B, H = z0.shape

    # --- Encoder CDE:  z_{k+1} = z_k + f(z_k) dX/dt(t_k) * dt_k --------------
    # Statically unrolled Euler loop (tiny trip count; equivalent to
    # lax.fori_loop(..., unroll=True)).  The dX/dt input is pre-expanded to
    # (n_steps, B, C*H) so the contraction is: whole-vreg multiply + one matmul.
    w1, b1 = fw1_ref[...], fb1_ref[...]
    w2, b2 = fw2_ref[...], fb2_ref[...]
    z = z0
    enc = z0                             # trajectory position 0 (= z(t_0))
    for k in range(n_steps):
        f = _mlp(z, w1, b1, w2, b2)                                  # (B, C*H)
        dz = jnp.dot(f * dxdt_ref[k], fold,
                     preferred_element_type=jnp.float32)             # (B, H)
        z = z + dz * dts_ref[k]
        enc = jnp.where(fidx == (k + 1), z, enc)   # per-batch gather at final_index

    # --- h0 = fc(Encoder) ------------------------------------------------------
    h = (jnp.dot(enc, fcw_ref[...], preferred_element_type=jnp.float32)
         + fcb_ref[...])                 # (B, H)

    # --- forecasting: dh/dt = func_f(h); dz/dt = func_g(z) dX/dt(t_N) ---------
    dt = dtf_ref[0]
    dxt = dxt_ref[...]                   # (B, C*H) expanded terminal derivative
    wf1, bf1 = ffw1_ref[...], ffb1_ref[...]
    wf2, bf2 = ffw2_ref[...], ffb2_ref[...]
    wg1, bg1 = gw1_ref[...], gb1_ref[...]
    wg2, bg2 = gw2_ref[...], gb2_ref[...]
    lw, lb = lw_ref[...], lb_ref[...]

    zf = z0                              # CDE state seeded with z0 (as in reference)
    ke = jnp.zeros((B, H), jnp.float32)  # per-lane KE accumulator (reduced once)
    for t in range(output_time):
        dh = _mlp(h, wf1, bf1, wf2, bf2)                              # (B, H)
        g = _mlp(zf, wg1, bg1, wg2, bg2)                              # (B, C*H)
        dz = jnp.dot(g * dxt, fold, preferred_element_type=jnp.float32)
        h = h + dh * dt
        zf = zf + dz * dt
        ke = ke + dh * dh
        # fused final linear: write prediction for this step directly
        pred_ref[t] = (jnp.dot(zf, lw, preferred_element_type=jnp.float32)
                       + lb).astype(pred_ref.dtype)

    # kinetic-energy regularizer, reduced and written exactly once
    reg_ref[...] = (jnp.sum(ke, axis=(0, 1), keepdims=True)
                    * (ke_coef * dt / float(B * H)))


# ----------------------------------------------------------------------------
# Full forward pass (mirrors NeuralCDE_IDEA4_forecasting2.forward, non-stream)
# ----------------------------------------------------------------------------
@functools.partial(jax.jit, static_argnames=("output_time", "kinetic_energy_coef"))
def neural_cde_forward(times, terminal_time, coeffs, final_index, params, *,
                       output_time, kinetic_energy_coef):
    a_c, b_c, _c_c, _d_c = coeffs            # each (B, T-1, C)
    B, n_steps, C = a_c.shape
    H = params["init_w"].shape[1]

    # --- natural-cubic-spline glue (plain JAX, tiny) --------------------------
    x0 = a_c[:, 0, :].astype(jnp.float32)                     # X(t_0)          (B, C)
    dxdt = jnp.transpose(b_c, (1, 0, 2)).astype(jnp.float32)  # dX/dt at knots  (T-1, B, C)
    dts = (times[1:] - times[:-1]).astype(jnp.float32)        # (T-1,)
    dt_fore = jnp.reshape((terminal_time - times[-1]) / output_time,
                          (1,)).astype(jnp.float32)

    # pre-expand dX/dt to (.., C*H) and build the constant fold matrix so the
    # in-kernel contraction is a whole-vreg multiply + one small matmul.
    dxdt_exp = jnp.repeat(dxdt, H, axis=-1)                   # (T-1, B, C*H)
    dxt_exp = dxdt_exp[-1]                                    # (B, C*H) terminal
    fold = jnp.tile(jnp.eye(H, dtype=jnp.float32), (C, 1))    # (C*H, H)
    fidx = final_index.astype(jnp.int32).reshape(B, 1)

    r2 = lambda b: b.reshape(1, -1).astype(jnp.float32)       # biases -> (1, dim)

    vmem = pl.BlockSpec(memory_space=pltpu.MemorySpace.VMEM)
    smem = pl.BlockSpec(memory_space=pltpu.MemorySpace.SMEM)

    kernel = functools.partial(fused_forward_kernel,
                               ke_coef=float(kinetic_energy_coef))

    pred_tbc, reg = pl.pallas_call(
        kernel,
        out_shape=(jax.ShapeDtypeStruct((output_time, B, C), jnp.float32),
                   jax.ShapeDtypeStruct((1, 1), jnp.float32)),
        in_specs=[smem, smem] + [vmem] * 23,
        out_specs=(vmem, vmem),
    )(dts, dt_fore, fidx, x0, dxdt_exp, dxt_exp, fold,
      params["init_w"], r2(params["init_b"]),
      params["fc_w"], r2(params["fc_b"]),
      params["lin_w"], r2(params["lin_b"]),
      params["f_w1"], r2(params["f_b1"]), params["f_w2"], r2(params["f_b2"]),
      params["ff_w1"], r2(params["ff_b1"]), params["ff_w2"], r2(params["ff_b2"]),
      params["g_w1"], r2(params["g_b1"]), params["g_w2"], r2(params["g_b2"]))

    # z_t.permute(1,0,2) equivalent on the tiny (T_out, B, C) prediction slab
    pred_y = jnp.transpose(pred_tbc, (1, 0, 2))               # (B, T_out, C)
    return pred_y, reg[0, 0]


# ----------------------------------------------------------------------------
# Deterministic parameter init
# ----------------------------------------------------------------------------
def init_params(key, C, H, HH):
    ks = jax.random.split(key, 14)
    n = lambda k, s: (0.3 * jax.random.normal(k, s)).astype(jnp.float32)
    return {
        # initial_network: Linear(C, H)
        "init_w": n(ks[0], (C, H)), "init_b": n(ks[1], (H,)),
        # fc: Linear(H, H)
        "fc_w": n(ks[2], (H, H)), "fc_b": n(ks[3], (H,)),
        # linear: Linear(H, C)
        "lin_w": n(ks[4], (H, C)), "lin_b": n(ks[5], (C,)),
        # func (encoder vector field): H -> HH -> C*H
        "f_w1": n(ks[6], (H, HH)), "f_b1": n(ks[7], (HH,)),
        "f_w2": n(ks[8], (HH, C * H)), "f_b2": n(ks[9], (C * H,)),
        # func_f (ODE field): H -> HH -> H
        "ff_w1": n(ks[10], (H, HH)), "ff_b1": n(ks[11], (HH,)),
        "ff_w2": n(ks[12], (HH, H)), "ff_b2": n(ks[13], (H,)),
        # func_g (forecast CDE field): H -> HH -> C*H
        "g_w1": n(jax.random.fold_in(key, 100), (H, HH)),
        "g_b1": n(jax.random.fold_in(key, 101), (HH,)),
        "g_w2": n(jax.random.fold_in(key, 102), (HH, C * H)),
        "g_b2": n(jax.random.fold_in(key, 103), (C * H,)),
    }


if __name__ == "__main__":
    B, C, H, HH = 2, 4, 16, 16          # batch, input, hidden, hidden_hidden
    T = 8                               # number of knots -> 7 integration steps
    OUTPUT_TIME = 4
    KE_COEF = 0.01

    key = jax.random.PRNGKey(0)
    kp, ka, kb, kc, kd = jax.random.split(key, 5)
    params = init_params(kp, C, H, HH)

    times = jnp.linspace(0.0, 1.0, T).astype(jnp.float32)
    terminal_time = jnp.float32(1.5)
    coeffs = (
        (0.5 * jax.random.normal(ka, (B, T - 1, C))).astype(jnp.float32),
        (0.5 * jax.random.normal(kb, (B, T - 1, C))).astype(jnp.float32),
        (0.1 * jax.random.normal(kc, (B, T - 1, C))).astype(jnp.float32),
        (0.1 * jax.random.normal(kd, (B, T - 1, C))).astype(jnp.float32),
    )
    final_index = jnp.array([T - 2, T - 3], dtype=jnp.int32)   # per-batch

    pred_y, reg = neural_cde_forward(
        times, terminal_time, coeffs, final_index, params,
        output_time=OUTPUT_TIME, kinetic_energy_coef=KE_COEF)

    jax.block_until_ready((pred_y, reg))
    assert pred_y.shape == (B, OUTPUT_TIME, C)
    assert jnp.all(jnp.isfinite(pred_y)) and jnp.isfinite(reg)
    print("KERNEL_OK")
</pallas_src>

<mosaic_0001>
module attributes {stable_mosaic.version = 11 : i64} {
  func.func @fused_forward_kernel(%arg0: memref<7xf32, #tpu.memory_space<smem>>, %arg1: memref<1xf32, #tpu.memory_space<smem>>, %arg2: memref<2x1xi32, #tpu.memory_space<vmem>>, %arg3: memref<2x4xf32, #tpu.memory_space<vmem>>, %arg4: memref<7x2x64xf32, #tpu.memory_space<vmem>>, %arg5: memref<2x64xf32, #tpu.memory_space<vmem>>, %arg6: memref<64x16xf32, #tpu.memory_space<vmem>>, %arg7: memref<4x16xf32, #tpu.memory_space<vmem>>, %arg8: memref<1x16xf32, #tpu.memory_space<vmem>>, %arg9: memref<16x16xf32, #tpu.memory_space<vmem>>, %arg10: memref<1x16xf32, #tpu.memory_space<vmem>>, %arg11: memref<16x4xf32, #tpu.memory_space<vmem>>, %arg12: memref<1x4xf32, #tpu.memory_space<vmem>>, %arg13: memref<16x16xf32, #tpu.memory_space<vmem>>, %arg14: memref<1x16xf32, #tpu.memory_space<vmem>>, %arg15: memref<16x64xf32, #tpu.memory_space<vmem>>, %arg16: memref<1x64xf32, #tpu.memory_space<vmem>>, %arg17: memref<16x16xf32, #tpu.memory_space<vmem>>, %arg18: memref<1x16xf32, #tpu.memory_space<vmem>>, %arg19: memref<16x16xf32, #tpu.memory_space<vmem>>, %arg20: memref<1x16xf32, #tpu.memory_space<vmem>>, %arg21: memref<16x16xf32, #tpu.memory_space<vmem>>, %arg22: memref<1x16xf32, #tpu.memory_space<vmem>>, %arg23: memref<16x64xf32, #tpu.memory_space<vmem>>, %arg24: memref<1x64xf32, #tpu.memory_space<vmem>>, %arg25: memref<4x2x4xf32, #tpu.memory_space<vmem>>, %arg26: memref<1x1xf32, #tpu.memory_space<vmem>>) attributes {dimension_semantics = [], scalar_prefetch = 0 : i64, scratch_operands = 0 : i64, tpu.core_type = #tpu.core_type<tc>} {
    %c0 = arith.constant 0 : index
    %c0_0 = arith.constant 0 : index
    %0 = vector.load %arg6[%c0, %c0_0] : memref<64x16xf32, #tpu.memory_space<vmem>>, vector<64x16xf32>
    %c0_1 = arith.constant 0 : index
    %c0_2 = arith.constant 0 : index
    %1 = vector.load %arg2[%c0_1, %c0_2] : memref<2x1xi32, #tpu.memory_space<vmem>>, vector<2x1xi32>
    %c0_3 = arith.constant 0 : index
    %c0_4 = arith.constant 0 : index
    %2 = vector.load %arg3[%c0_3, %c0_4] : memref<2x4xf32, #tpu.memory_space<vmem>>, vector<2x4xf32>
    %c0_5 = arith.constant 0 : index
    %c0_6 = arith.constant 0 : index
    %3 = vector.load %arg7[%c0_5, %c0_6] : memref<4x16xf32, #tpu.memory_space<vmem>>, vector<4x16xf32>
    %cst = arith.constant dense<0.000000e+00> : vector<2x16xf32>
    %4 = tpu.matmul %2, %3, %cst {dimension_numbers = #tpu.dot_dimension_numbers<[1], [0], [0], [1], [0, 0, 1, 1], [], []>} : vector<2x4xf32>, vector<4x16xf32>, vector<2x16xf32> -> vector<2x16xf32>
    %c0_7 = arith.constant 0 : index
    %c0_8 = arith.constant 0 : index
    %5 = vector.load %arg8[%c0_7, %c0_8] : memref<1x16xf32, #tpu.memory_space<vmem>>, vector<1x16xf32>
    %6 = vector.broadcast %5 : vector<1x16xf32> to vector<2x16xf32>
    %7 = arith.addf %4, %6 : vector<2x16xf32>
    %c0_9 = arith.constant 0 : index
    %c0_10 = arith.constant 0 : index
    %8 = vector.load %arg13[%c0_9, %c0_10] : memref<16x16xf32, #tpu.memory_space<vmem>>, vector<16x16xf32>
    %c0_11 = arith.constant 0 : index
    %c0_12 = arith.constant 0 : index
    %9 = vector.load %arg14[%c0_11, %c0_12] : memref<1x16xf32, #tpu.memory_space<vmem>>, vector<1x16xf32>
    %c0_13 = arith.constant 0 : index
    %c0_14 = arith.constant 0 : index
    %10 = vector.load %arg15[%c0_13, %c0_14] : memref<16x64xf32, #tpu.memory_space<vmem>>, vector<16x64xf32>
    %c0_15 = arith.constant 0 : index
    %c0_16 = arith.constant 0 : index
    %11 = vector.load %arg16[%c0_15, %c0_16] : memref<1x64xf32, #tpu.memory_space<vmem>>, vector<1x64xf32>
    %cst_17 = arith.constant dense<0.000000e+00> : vector<2x16xf32>
    %12 = tpu.matmul %7, %8, %cst_17 {dimension_numbers = #tpu.dot_dimension_numbers<[1], [0], [0], [1], [0, 0, 1, 1], [], []>} : vector<2x16xf32>, vector<16x16xf32>, vector<2x16xf32> -> vector<2x16xf32>
    %13 = vector.broadcast %9 : vector<1x16xf32> to vector<2x16xf32>
    %14 = arith.addf %12, %13 : vector<2x16xf32>
    %cst_18 = arith.constant 0.000000e+00 : f32
    %15 = vector.broadcast %cst_18 : f32 to vector<2x16xf32>
    %16 = arith.maximumf %14, %15 : vector<2x16xf32>
    %cst_19 = arith.constant dense<0.000000e+00> : vector<2x64xf32>
    %17 = tpu.matmul %16, %10, %cst_19 {dimension_numbers = #tpu.dot_dimension_numbers<[1], [0], [0], [1], [0, 0, 1, 1], [], []>} : vector<2x16xf32>, vector<16x64xf32>, vector<2x64xf32> -> vector<2x64xf32>
    %18 = vector.broadcast %11 : vector<1x64xf32> to vector<2x64xf32>
    %19 = arith.addf %17, %18 : vector<2x64xf32>
    %20 = math.tanh %19 : vector<2x64xf32>
    %c0_20 = arith.constant 0 : index
    %c0_21 = arith.constant 0 : index
    %c0_22 = arith.constant 0 : index
    %21 = vector.load %arg4[%c0_20, %c0_21, %c0_22] : memref<7x2x64xf32, #tpu.memory_space<vmem>>, vector<1x2x64xf32>
    %22 = vector.shape_cast %21 : vector<1x2x64xf32> to vector<2x64xf32>
    %23 = arith.mulf %20, %22 : vector<2x64xf32>
    %cst_23 = arith.constant dense<0.000000e+00> : vector<2x16xf32>
    %24 = tpu.matmul %23, %0, %cst_23 {dimension_numbers = #tpu.dot_dimension_numbers<[1], [0], [0], [1], [0, 0, 1, 1], [], []>} : vector<2x64xf32>, vector<64x16xf32>, vector<2x16xf32> -> vector<2x16xf32>
    %c0_24 = arith.constant 0 : index
    %25 = memref.load %arg0[%c0_24] : memref<7xf32, #tpu.memory_space<smem>>
    %26 = vector.broadcast %25 : f32 to vector<2x16xf32>
    %27 = arith.mulf %24, %26 : vector<2x16xf32>
    %28 = arith.addf %7, %27 : vector<2x16xf32>
    %c1_i32 = arith.constant 1 : i32
    %29 = vector.broadcast %c1_i32 : i32 to vector<2x1xi32>
    %30 = arith.cmpi eq, %1, %29 : vector<2x1xi32>
    %31 = vector.shape_cast %30 : vector<2x1xi1> to vector<2x1xi1>
    %32 = vector.broadcast %31 : vector<2x1xi1> to vector<2x16xi1>
    %33 = arith.select %32, %28, %7 : vector<2x16xi1>, vector<2x16xf32>
    %cst_25 = arith.constant dense<0.000000e+00> : vector<2x16xf32>
    %34 = tpu.matmul %28, %8, %cst_25 {dimension_numbers = #tpu.dot_dimension_numbers<[1], [0], [0], [1], [0, 0, 1, 1], [], []>} : vector<2x16xf32>, vector<16x16xf32>, vector<2x16xf32> -> vector<2x16xf32>
    %35 = vector.broadcast %9 : vector<1x16xf32> to vector<2x16xf32>
    %36 = arith.addf %34, %35 : vector<2x16xf32>
    %cst_26 = arith.constant 0.000000e+00 : f32
    %37 = vector.broadcast %cst_26 : f32 to vector<2x16xf32>
    %38 = arith.maximumf %36, %37 : vector<2x16xf32>
    %cst_27 = arith.constant dense<0.000000e+00> : vector<2x64xf32>
    %39 = tpu.matmul %38, %10, %cst_27 {dimension_numbers = #tpu.dot_dimension_numbers<[1], [0], [0], [1], [0, 0, 1, 1], [], []>} : vector<2x16xf32>, vector<16x64xf32>, vector<2x64xf32> -> vector<2x64xf32>
    %40 = vector.broadcast %11 : vector<1x64xf32> to vector<2x64xf32>
    %41 = arith.addf %39, %40 : vector<2x64xf32>
    %42 = math.tanh %41 : vector<2x64xf32>
    %c1 = arith.constant 1 : index
    %c0_28 = arith.constant 0 : index
    %c0_29 = arith.constant 0 : index
    %43 = vector.load %arg4[%c1, %c0_28, %c0_29] : memref<7x2x64xf32, #tpu.memory_space<vmem>>, vector<1x2x64xf32>
    %44 = vector.shape_cast %43 : vector<1x2x64xf32> to vector<2x64xf32>
    %45 = arith.mulf %42, %44 : vector<2x64xf32>
    %cst_30 = arith.constant dense<0.000000e+00> : vector<2x16xf32>
    %46 = tpu.matmul %45, %0, %cst_30 {dimension_numbers = #tpu.dot_dimension_numbers<[1], [0], [0], [1], [0, 0, 1, 1], [], []>} : vector<2x64xf32>, vector<64x16xf32>, vector<2x16xf32> -> vector<2x16xf32>
    %c1_31 = arith.constant 1 : index
    %47 = memref.load %arg0[%c1_31] : memref<7xf32, #tpu.memory_space<smem>>
    %48 = vector.broadcast %47 : f32 to vector<2x16xf32>
    %49 = arith.mulf %46, %48 : vector<2x16xf32>
    %50 = arith.addf %28, %49 : vector<2x16xf32>
    %c2_i32 = arith.constant 2 : i32
    %51 = vector.broadcast %c2_i32 : i32 to vector<2x1xi32>
    %52 = arith.cmpi eq, %1, %51 : vector<2x1xi32>
    %53 = vector.shape_cast %52 : vector<2x1xi1> to vector<2x1xi1>
    %54 = vector.broadcast %53 : vector<2x1xi1> to vector<2x16xi1>
    %55 = arith.select %54, %50, %33 : vector<2x16xi1>, vector<2x16xf32>
    %cst_32 = arith.constant dense<0.000000e+00> : vector<2x16xf32>
    %56 = tpu.matmul %50, %8, %cst_32 {dimension_numbers = #tpu.dot_dimension_numbers<[1], [0], [0], [1], [0, 0, 1, 1], [], []>} : vector<2x16xf32>, vector<16x16xf32>, vector<2x16xf32> -> vector<2x16xf32>
    %57 = vector.broadcast %9 : vector<1x16xf32> to vector<2x16xf32>
    %58 = arith.addf %56, %57 : vector<2x16xf32>
    %cst_33 = arith.constant 0.000000e+00 : f32
    %59 = vector.broadcast %cst_33 : f32 to vector<2x16xf32>
    %60 = arith.maximumf %58, %59 : vector<2x16xf32>
    %cst_34 = arith.constant dense<0.000000e+00> : vector<2x64xf32>
    %61 = tpu.matmul %60, %10, %cst_34 {dimension_numbers = #tpu.dot_dimension_numbers<[1], [0], [0], [1], [0, 0, 1, 1], [], []>} : vector<2x16xf32>, vector<16x64xf32>, vector<2x64xf32> -> vector<2x64xf32>
    %62 = vector.broadcast %11 : vector<1x64xf32> to vector<2x64xf32>
    %63 = arith.addf %61, %62 : vector<2x64xf32>
    %64 = math.tanh %63 : vector<2x64xf32>
    %c2 = arith.constant 2 : index
    %c0_35 = arith.constant 0 : index
    %c0_36 = arith.constant 0 : index
    %65 = vector.load %arg4[%c2, %c0_35, %c0_36] : memref<7x2x64xf32, #tpu.memory_space<vmem>>, vector<1x2x64xf32>
    %66 = vector.shape_cast %65 : vector<1x2x64xf32> to vector<2x64xf32>
    %67 = arith.mulf %64, %66 : vector<2x64xf32>
    %cst_37 = arith.constant dense<0.000000e+00> : vector<2x16xf32>
    %68 = tpu.matmul %67, %0, %cst_37 {dimension_numbers = #tpu.dot_dimension_numbers<[1], [0], [0], [1], [0, 0, 1, 1], [], []>} : vector<2x64xf32>, vector<64x16xf32>, vector<2x16xf32> -> vector<2x16xf32>
    %c2_38 = arith.constant 2 : index
    %69 = memref.load %arg0[%c2_38] : memref<7xf32, #tpu.memory_space<smem>>
    %70 = vector.broadcast %69 : f32 to vector<2x16xf32>
    %71 = arith.mulf %68, %70 : vector<2x16xf32>
    %72 = arith.addf %50, %71 : vector<2x16xf32>
    %c3_i32 = arith.constant 3 : i32
    %73 = vector.broadcast %c3_i32 : i32 to vector<2x1xi32>
    %74 = arith.cmpi eq, %1, %73 : vector<2x1xi32>
    %75 = vector.shape_cast %74 : vector<2x1xi1> to vector<2x1xi1>
    %76 = vector.broadcast %75 : vector<2x1xi1> to vector<2x16xi1>
    %77 = arith.select %76, %72, %55 : vector<2x16xi1>, vector<2x16xf32>
    %cst_39 = arith.constant dense<0.000000e+00> : vector<2x16xf32>
    %78 = tpu.matmul %72, %8, %cst_39 {dimension_numbers = #tpu.dot_dimension_numbers<[1], [0], [0], [1], [0, 0, 1, 1], [], []>} : vector<2x16xf32>, vector<16x16xf32>, vector<2x16xf32> -> vector<2x16xf32>
    %79 = vector.broadcast %9 : vector<1x16xf32> to vector<2x16xf32>
    %80 = arith.addf %78, %79 : vector<2x16xf32>
    %cst_40 = arith.constant 0.000000e+00 : f32
    %81 = vector.broadcast %cst_40 : f32 to vector<2x16xf32>
    %82 = arith.maximumf %80, %81 : vector<2x16xf32>
    %cst_41 = arith.constant dense<0.000000e+00> : vector<2x64xf32>
    %83 = tpu.matmul %82, %10, %cst_41 {dimension_numbers = #tpu.dot_dimension_numbers<[1], [0], [0], [1], [0, 0, 1, 1], [], []>} : vector<2x16xf32>, vector<16x64xf32>, vector<2x64xf32> -> vector<2x64xf32>
    %84 = vector.broadcast %11 : vector<1x64xf32> to vector<2x64xf32>
    %85 = arith.addf %83, %84 : vector<2x64xf32>
    %86 = math.tanh %85 : vector<2x64xf32>
    %c3 = arith.constant 3 : index
    %c0_42 = arith.constant 0 : index
    %c0_43 = arith.constant 0 : index
    %87 = vector.load %arg4[%c3, %c0_42, %c0_43] : memref<7x2x64xf32, #tpu.memory_space<vmem>>, vector<1x2x64xf32>
    %88 = vector.shape_cast %87 : vector<1x2x64xf32> to vector<2x64xf32>
    %89 = arith.mulf %86, %88 : vector<2x64xf32>
    %cst_44 = arith.constant dense<0.000000e+00> : vector<2x16xf32>
    %90 = tpu.matmul %89, %0, %cst_44 {dimension_numbers = #tpu.dot_dimension_numbers<[1], [0], [0], [1], [0, 0, 1, 1], [], []>} : vector<2x64xf32>, vector<64x16xf32>, vector<2x16xf32> -> vector<2x16xf32>
    %c3_45 = arith.constant 3 : index
    %91 = memref.load %arg0[%c3_45] : memref<7xf32, #tpu.memory_space<smem>>
    %92 = vector.broadcast %91 : f32 to vector<2x16xf32>
    %93 = arith.mulf %90, %92 : vector<2x16xf32>
    %94 = arith.addf %72, %93 : vector<2x16xf32>
    %c4_i32 = arith.constant 4 : i32
    %95 = vector.broadcast %c4_i32 : i32 to vector<2x1xi32>
    %96 = arith.cmpi eq, %1, %95 : vector<2x1xi32>
    %97 = vector.shape_cast %96 : vector<2x1xi1> to vector<2x1xi1>
    %98 = vector.broadcast %97 : vector<2x1xi1> to vector<2x16xi1>
    %99 = arith.select %98, %94, %77 : vector<2x16xi1>, vector<2x16xf32>
    %cst_46 = arith.constant dense<0.000000e+00> : vector<2x16xf32>
    %100 = tpu.matmul %94, %8, %cst_46 {dimension_numbers = #tpu.dot_dimension_numbers<[1], [0], [0], [1], [0, 0, 1, 1], [], []>} : vector<2x16xf32>, vector<16x16xf32>, vector<2x16xf32> -> vector<2x16xf32>
    %101 = vector.broadcast %9 : vector<1x16xf32> to vector<2x16xf32>
    %102 = arith.addf %100, %101 : vector<2x16xf32>
    %cst_47 = arith.constant 0.000000e+00 : f32
    %103 = vector.broadcast %cst_47 : f32 to vector<2x16xf32>
    %104 = arith.maximumf %102, %103 : vector<2x16xf32>
    %cst_48 = arith.constant dense<0.000000e+00> : vector<2x64xf32>
    %105 = tpu.matmul %104, %10, %cst_48 {dimension_numbers = #tpu.dot_dimension_numbers<[1], [0], [0], [1], [0, 0, 1, 1], [], []>} : vector<2x16xf32>, vector<16x64xf32>, vector<2x64xf32> -> vector<2x64xf32>
    %106 = vector.broadcast %11 : vector<1x64xf32> to vector<2x64xf32>
    %107 = arith.addf %105, %106 : vector<2x64xf32>
    %108 = math.tanh %107 : vector<2x64xf32>
    %c4 = arith.constant 4 : index
    %c0_49 = arith.constant 0 : index
    %c0_50 = arith.constant 0 : index
    %109 = vector.load %arg4[%c4, %c0_49, %c0_50] : memref<7x2x64xf32, #tpu.memory_space<vmem>>, vector<1x2x64xf32>
    %110 = vector.shape_cast %109 : vector<1x2x64xf32> to vector<2x64xf32>
    %111 = arith.mulf %108, %110 : vector<2x64xf32>
    %cst_51 = arith.constant dense<0.000000e+00> : vector<2x16xf32>
    %112 = tpu.matmul %111, %0, %cst_51 {dimension_numbers = #tpu.dot_dimension_numbers<[1], [0], [0], [1], [0, 0, 1, 1], [], []>} : vector<2x64xf32>, vector<64x16xf32>, vector<2x16xf32> -> vector<2x16xf32>
    %c4_52 = arith.constant 4 : index
    %113 = memref.load %arg0[%c4_52] : memref<7xf32, #tpu.memory_space<smem>>
    %114 = vector.broadcast %113 : f32 to vector<2x16xf32>
    %115 = arith.mulf %112, %114 : vector<2x16xf32>
    %116 = arith.addf %94, %115 : vector<2x16xf32>
    %c5_i32 = arith.constant 5 : i32
    %117 = vector.broadcast %c5_i32 : i32 to vector<2x1xi32>
    %118 = arith.cmpi eq, %1, %117 : vector<2x1xi32>
    %119 = vector.shape_cast %118 : vector<2x1xi1> to vector<2x1xi1>
    %120 = vector.broadcast %119 : vector<2x1xi1> to vector<2x16xi1>
    %121 = arith.select %120, %116, %99 : vector<2x16xi1>, vector<2x16xf32>
    %cst_53 = arith.constant dense<0.000000e+00> : vector<2x16xf32>
    %122 = tpu.matmul %116, %8, %cst_53 {dimension_numbers = #tpu.dot_dimension_numbers<[1], [0], [0], [1], [0, 0, 1, 1], [], []>} : vector<2x16xf32>, vector<16x16xf32>, vector<2x16xf32> -> vector<2x16xf32>
    %123 = vector.broadcast %9 : vector<1x16xf32> to vector<2x16xf32>
    %124 = arith.addf %122, %123 : vector<2x16xf32>
    %cst_54 = arith.constant 0.000000e+00 : f32
    %125 = vector.broadcast %cst_54 : f32 to vector<2x16xf32>
    %126 = arith.maximumf %124, %125 : vector<2x16xf32>
    %cst_55 = arith.constant dense<0.000000e+00> : vector<2x64xf32>
    %127 = tpu.matmul %126, %10, %cst_55 {dimension_numbers = #tpu.dot_dimension_numbers<[1], [0], [0], [1], [0, 0, 1, 1], [], []>} : vector<2x16xf32>, vector<16x64xf32>, vector<2x64xf32> -> vector<2x64xf32>
    %128 = vector.broadcast %11 : vector<1x64xf32> to vector<2x64xf32>
    %129 = arith.addf %127, %128 : vector<2x64xf32>
    %130 = math.tanh %129 : vector<2x64xf32>
    %c5 = arith.constant 5 : index
    %c0_56 = arith.constant 0 : index
    %c0_57 = arith.constant 0 : index
    %131 = vector.load %arg4[%c5, %c0_56, %c0_57] : memref<7x2x64xf32, #tpu.memory_space<vmem>>, vector<1x2x64xf32>
    %132 = vector.shape_cast %131 : vector<1x2x64xf32> to vector<2x64xf32>
    %133 = arith.mulf %130, %132 : vector<2x64xf32>
    %cst_58 = arith.constant dense<0.000000e+00> : vector<2x16xf32>
    %134 = tpu.matmul %133, %0, %cst_58 {dimension_numbers = #tpu.dot_dimension_numbers<[1], [0], [0], [1], [0, 0, 1, 1], [], []>} : vector<2x64xf32>, vector<64x16xf32>, vector<2x16xf32> -> vector<2x16xf32>
    %c5_59 = arith.constant 5 : index
    %135 = memref.load %arg0[%c5_59] : memref<7xf32, #tpu.memory_space<smem>>
    %136 = vector.broadcast %135 : f32 to vector<2x16xf32>
    %137 = arith.mulf %134, %136 : vector<2x16xf32>
    %138 = arith.addf %116, %137 : vector<2x16xf32>
    %c6_i32 = arith.constant 6 : i32
    %139 = vector.broadcast %c6_i32 : i32 to vector<2x1xi32>
    %140 = arith.cmpi eq, %1, %139 : vector<2x1xi32>
    %141 = vector.shape_cast %140 : vector<2x1xi1> to vector<2x1xi1>
    %142 = vector.broadcast %141 : vector<2x1xi1> to vector<2x16xi1>
    %143 = arith.select %142, %138, %121 : vector<2x16xi1>, vector<2x16xf32>
    %cst_60 = arith.constant dense<0.000000e+00> : vector<2x16xf32>
    %144 = tpu.matmul %138, %8, %cst_60 {dimension_numbers = #tpu.dot_dimension_numbers<[1], [0], [0], [1], [0, 0, 1, 1], [], []>} : vector<2x16xf32>, vector<16x16xf32>, vector<2x16xf32> -> vector<2x16xf32>
    %145 = vector.broadcast %9 : vector<1x16xf32> to vector<2x16xf32>
    %146 = arith.addf %144, %145 : vector<2x16xf32>
    %cst_61 = arith.constant 0.000000e+00 : f32
    %147 = vector.broadcast %cst_61 : f32 to vector<2x16xf32>
    %148 = arith.maximumf %146, %147 : vector<2x16xf32>
    %cst_62 = arith.constant dense<0.000000e+00> : vector<2x64xf32>
    %149 = tpu.matmul %148, %10, %cst_62 {dimension_numbers = #tpu.dot_dimension_numbers<[1], [0], [0], [1], [0, 0, 1, 1], [], []>} : vector<2x16xf32>, vector<16x64xf32>, vector<2x64xf32> -> vector<2x64xf32>
    %150 = vector.broadcast %11 : vector<1x64xf32> to vector<2x64xf32>
    %151 = arith.addf %149, %150 : vector<2x64xf32>
    %152 = math.tanh %151 : vector<2x64xf32>
    %c6 = arith.constant 6 : index
    %c0_63 = arith.constant 0 : index
    %c0_64 = arith.constant 0 : index
    %153 = vector.load %arg4[%c6, %c0_63, %c0_64] : memref<7x2x64xf32, #tpu.memory_space<vmem>>, vector<1x2x64xf32>
    %154 = vector.shape_cast %153 : vector<1x2x64xf32> to vector<2x64xf32>
    %155 = arith.mulf %152, %154 : vector<2x64xf32>
    %cst_65 = arith.constant dense<0.000000e+00> : vector<2x16xf32>
    %156 = tpu.matmul %155, %0, %cst_65 {dimension_numbers = #tpu.dot_dimension_numbers<[1], [0], [0], [1], [0, 0, 1, 1], [], []>} : vector<2x64xf32>, vector<64x16xf32>, vector<2x16xf32> -> vector<2x16xf32>
    %c6_66 = arith.constant 6 : index
    %157 = memref.load %arg0[%c6_66] : memref<7xf32, #tpu.memory_space<smem>>
    %158 = vector.broadcast %157 : f32 to vector<2x16xf32>
    %159 = arith.mulf %156, %158 : vector<2x16xf32>
    %160 = arith.addf %138, %159 : vector<2x16xf32>
    %c7_i32 = arith.constant 7 : i32
    %161 = vector.broadcast %c7_i32 : i32 to vector<2x1xi32>
    %162 = arith.cmpi eq, %1, %161 : vector<2x1xi32>
    %163 = vector.shape_cast %162 : vector<2x1xi1> to vector<2x1xi1>
    %164 = vector.broadcast %163 : vector<2x1xi1> to vector<2x16xi1>
    %165 = arith.select %164, %160, %143 : vector<2x16xi1>, vector<2x16xf32>
    %c0_67 = arith.constant 0 : index
    %c0_68 = arith.constant 0 : index
    %166 = vector.load %arg9[%c0_67, %c0_68] : memref<16x16xf32, #tpu.memory_space<vmem>>, vector<16x16xf32>
    %cst_69 = arith.constant dense<0.000000e+00> : vector<2x16xf32>
    %167 = tpu.matmul %165, %166, %cst_69 {dimension_numbers = #tpu.dot_dimension_numbers<[1], [0], [0], [1], [0, 0, 1, 1], [], []>} : vector<2x16xf32>, vector<16x16xf32>, vector<2x16xf32> -> vector<2x16xf32>
    %c0_70 = arith.constant 0 : index
    %c0_71 = arith.constant 0 : index
    %168 = vector.load %arg10[%c0_70, %c0_71] : memref<1x16xf32, #tpu.memory_space<vmem>>, vector<1x16xf32>
    %169 = vector.broadcast %168 : vector<1x16xf32> to vector<2x16xf32>
    %170 = arith.addf %167, %169 : vector<2x16xf32>
    %c0_72 = arith.constant 0 : index
    %171 = memref.load %arg1[%c0_72] : memref<1xf32, #tpu.memory_space<smem>>
    %c0_73 = arith.constant 0 : index
    %c0_74 = arith.constant 0 : index
    %172 = vector.load %arg5[%c0_73, %c0_74] : memref<2x64xf32, #tpu.memory_space<vmem>>, vector<2x64xf32>
    %c0_75 = arith.constant 0 : index
    %c0_76 = arith.constant 0 : index
    %173 = vector.load %arg17[%c0_75, %c0_76] : memref<16x16xf32, #tpu.memory_space<vmem>>, vector<16x16xf32>
    %c0_77 = arith.constant 0 : index
    %c0_78 = arith.constant 0 : index
    %174 = vector.load %arg18[%c0_77, %c0_78] : memref<1x16xf32, #tpu.memory_space<vmem>>, vector<1x16xf32>
    %c0_79 = arith.constant 0 : index
    %c0_80 = arith.constant 0 : index
    %175 = vector.load %arg19[%c0_79, %c0_80] : memref<16x16xf32, #tpu.memory_space<vmem>>, vector<16x16xf32>
    %c0_81 = arith.constant 0 : index
    %c0_82 = arith.constant 0 : index
    %176 = vector.load %arg20[%c0_81, %c0_82] : memref<1x16xf32, #tpu.memory_space<vmem>>, vector<1x16xf32>
    %c0_83 = arith.constant 0 : index
    %c0_84 = arith.constant 0 : index
    %177 = vector.load %arg21[%c0_83, %c0_84] : memref<16x16xf32, #tpu.memory_space<vmem>>, vector<16x16xf32>
    %c0_85 = arith.constant 0 : index
    %c0_86 = arith.constant 0 : index
    %178 = vector.load %arg22[%c0_85, %c0_86] : memref<1x16xf32, #tpu.memory_space<vmem>>, vector<1x16xf32>
    %c0_87 = arith.constant 0 : index
    %c0_88 = arith.constant 0 : index
    %179 = vector.load %arg23[%c0_87, %c0_88] : memref<16x64xf32, #tpu.memory_space<vmem>>, vector<16x64xf32>
    %c0_89 = arith.constant 0 : index
    %c0_90 = arith.constant 0 : index
    %180 = vector.load %arg24[%c0_89, %c0_90] : memref<1x64xf32, #tpu.memory_space<vmem>>, vector<1x64xf32>
    %c0_91 = arith.constant 0 : index
    %c0_92 = arith.constant 0 : index
    %181 = vector.load %arg11[%c0_91, %c0_92] : memref<16x4xf32, #tpu.memory_space<vmem>>, vector<16x4xf32>
    %c0_93 = arith.constant 0 : index
    %c0_94 = arith.constant 0 : index
    %182 = vector.load %arg12[%c0_93, %c0_94] : memref<1x4xf32, #tpu.memory_space<vmem>>, vector<1x4xf32>
    %cst_95 = arith.constant 0.000000e+00 : f32
    %183 = vector.broadcast %cst_95 : f32 to vector<2x16xf32>
    %cst_96 = arith.constant dense<0.000000e+00> : vector<2x16xf32>
    %184 = tpu.matmul %170, %173, %cst_96 {dimension_numbers = #tpu.dot_dimension_numbers<[1], [0], [0], [1], [0, 0, 1, 1], [], []>} : vector<2x16xf32>, vector<16x16xf32>, vector<2x16xf32> -> vector<2x16xf32>
    %185 = vector.broadcast %174 : vector<1x16xf32> to vector<2x16xf32>
    %186 = arith.addf %184, %185 : vector<2x16xf32>
    %cst_97 = arith.constant 0.000000e+00 : f32
    %187 = vector.broadcast %cst_97 : f32 to vector<2x16xf32>
    %188 = arith.maximumf %186, %187 : vector<2x16xf32>
    %cst_98 = arith.constant dense<0.000000e+00> : vector<2x16xf32>
    %189 = tpu.matmul %188, %175, %cst_98 {dimension_numbers = #tpu.dot_dimension_numbers<[1], [0], [0], [1], [0, 0, 1, 1], [], []>} : vector<2x16xf32>, vector<16x16xf32>, vector<2x16xf32> -> vector<2x16xf32>
    %190 = vector.broadcast %176 : vector<1x16xf32> to vector<2x16xf32>
    %191 = arith.addf %189, %190 : vector<2x16xf32>
    %192 = math.tanh %191 : vector<2x16xf32>
    %cst_99 = arith.constant dense<0.000000e+00> : vector<2x16xf32>
    %193 = tpu.matmul %7, %177, %cst_99 {dimension_numbers = #tpu.dot_dimension_numbers<[1], [0], [0], [1], [0, 0, 1, 1], [], []>} : vector<2x16xf32>, vector<16x16xf32>, vector<2x16xf32> -> vector<2x16xf32>
    %194 = vector.broadcast %178 : vector<1x16xf32> to vector<2x16xf32>
    %195 = arith.addf %193, %194 : vector<2x16xf32>
    %cst_100 = arith.constant 0.000000e+00 : f32
    %196 = vector.broadcast %cst_100 : f32 to vector<2x16xf32>
    %197 = arith.maximumf %195, %196 : vector<2x16xf32>
    %cst_101 = arith.constant dense<0.000000e+00> : vector<2x64xf32>
    %198 = tpu.matmul %197, %179, %cst_101 {dimension_numbers = #tpu.dot_dimension_numbers<[1], [0], [0], [1], [0, 0, 1, 1], [], []>} : vector<2x16xf32>, vector<16x64xf32>, vector<2x64xf32> -> vector<2x64xf32>
    %199 = vector.broadcast %180 : vector<1x64xf32> to vector<2x64xf32>
    %200 = arith.addf %198, %199 : vector<2x64xf32>
    %201 = math.tanh %200 : vector<2x64xf32>
    %202 = arith.mulf %201, %172 : vector<2x64xf32>
    %cst_102 = arith.constant dense<0.000000e+00> : vector<2x16xf32>
    %203 = tpu.matmul %202, %0, %cst_102 {dimension_numbers = #tpu.dot_dimension_numbers<[1], [0], [0], [1], [0, 0, 1, 1], [], []>} : vector<2x64xf32>, vector<64x16xf32>, vector<2x16xf32> -> vector<2x16xf32>
    %204 = vector.broadcast %171 : f32 to vector<2x16xf32>
    %205 = arith.mulf %192, %204 : vector<2x16xf32>
    %206 = arith.addf %170, %205 : vector<2x16xf32>
    %207 = vector.broadcast %171 : f32 to vector<2x16xf32>
    %208 = arith.mulf %203, %207 : vector<2x16xf32>
    %209 = arith.addf %7, %208 : vector<2x16xf32>
    %210 = arith.mulf %192, %192 : vector<2x16xf32>
    %211 = arith.addf %183, %210 : vector<2x16xf32>
    %cst_103 = arith.constant dense<0.000000e+00> : vector<2x4xf32>
    %212 = tpu.matmul %209, %181, %cst_103 {dimension_numbers = #tpu.dot_dimension_numbers<[1], [0], [0], [1], [0, 0, 1, 1], [], []>} : vector<2x16xf32>, vector<16x4xf32>, vector<2x4xf32> -> vector<2x4xf32>
    %213 = vector.broadcast %182 : vector<1x4xf32> to vector<2x4xf32>
    %214 = arith.addf %212, %213 : vector<2x4xf32>
    %c0_104 = arith.constant 0 : index
    %c0_105 = arith.constant 0 : index
    %c0_106 = arith.constant 0 : index
    %215 = vector.load %arg25[%c0_104, %c0_105, %c0_106] : memref<4x2x4xf32, #tpu.memory_space<vmem>>, vector<1x2x4xf32>
    %216 = vector.shape_cast %215 : vector<1x2x4xf32> to vector<2x4xf32>
    %217 = vector.shape_cast %214 : vector<2x4xf32> to vector<1x2x4xf32>
    tpu.vector_store %arg25[%c0_104, %c0_105, %c0_106], %217 {strides = array<i32>} : memref<4x2x4xf32, #tpu.memory_space<vmem>>, vector<1x2x4xf32>,
    %cst_107 = arith.constant dense<0.000000e+00> : vector<2x16xf32>
    %218 = tpu.matmul %206, %173, %cst_107 {dimension_numbers = #tpu.dot_dimension_numbers<[1], [0], [0], [1], [0, 0, 1, 1], [], []>} : vector<2x16xf32>, vector<16x16xf32>, vector<2x16xf32> -> vector<2x16xf32>
    %219 = vector.broadcast %174 : vector<1x16xf32> to vector<2x16xf32>
    %220 = arith.addf %218, %219 : vector<2x16xf32>
    %cst_108 = arith.constant 0.000000e+00 : f32
    %221 = vector.broadcast %cst_108 : f32 to vector<2x16xf32>
    %222 = arith.maximumf %220, %221 : vector<2x16xf32>
    %cst_109 = arith.constant dense<0.000000e+00> : vector<2x16xf32>
    %223 = tpu.matmul %222, %175, %cst_109 {dimension_numbers = #tpu.dot_dimension_numbers<[1], [0], [0], [1], [0, 0, 1, 1], [], []>} : vector<2x16xf32>, vector<16x16xf32>, vector<2x16xf32> -> vector<2x16xf32>
    %224 = vector.broadcast %176 : vector<1x16xf32> to vector<2x16xf32>
    %225 = arith.addf %223, %224 : vector<2x16xf32>
    %226 = math.tanh %225 : vector<2x16xf32>
    %cst_110 = arith.constant dense<0.000000e+00> : vector<2x16xf32>
    %227 = tpu.matmul %209, %177, %cst_110 {dimension_numbers = #tpu.dot_dimension_numbers<[1], [0], [0], [1], [0, 0, 1, 1], [], []>} : vector<2x16xf32>, vector<16x16xf32>, vector<2x16xf32> -> vector<2x16xf32>
    %228 = vector.broadcast %178 : vector<1x16xf32> to vector<2x16xf32>
    %229 = arith.addf %227, %228 : vector<2x16xf32>
    %cst_111 = arith.constant 0.000000e+00 : f32
    %230 = vector.broadcast %cst_111 : f32 to vector<2x16xf32>
    %231 = arith.maximumf %229, %230 : vector<2x16xf32>
    %cst_112 = arith.constant dense<0.000000e+00> : vector<2x64xf32>
    %232 = tpu.matmul %231, %179, %cst_112 {dimension_numbers = #tpu.dot_dimension_numbers<[1], [0], [0], [1], [0, 0, 1, 1], [], []>} : vector<2x16xf32>, vector<16x64xf32>, vector<2x64xf32> -> vector<2x64xf32>
    %233 = vector.broadcast %180 : vector<1x64xf32> to vector<2x64xf32>
    %234 = arith.addf %232, %233 : vector<2x64xf32>
    %235 = math.tanh %234 : vector<2x64xf32>
    %236 = arith.mulf %235, %172 : vector<2x64xf32>
    %cst_113 = arith.constant dense<0.000000e+00> : vector<2x16xf32>
    %237 = tpu.matmul %236, %0, %cst_113 {dimension_numbers = #tpu.dot_dimension_numbers<[1], [0], [0], [1], [0, 0, 1, 1], [], []>} : vector<2x64xf32>, vector<64x16xf32>, vector<2x16xf32> -> vector<2x16xf32>
    %238 = vector.broadcast %171 : f32 to vector<2x16xf32>
    %239 = arith.mulf %226, %238 : vector<2x16xf32>
    %240 = arith.addf %206, %239 : vector<2x16xf32>
    %241 = vector.broadcast %171 : f32 to vector<2x16xf32>
    %242 = arith.mulf %237, %241 : vector<2x16xf32>
    %243 = arith.addf %209, %242 : vector<2x16xf32>
    %244 = arith.mulf %226, %226 : vector<2x16xf32>
    %245 = arith.addf %211, %244 : vector<2x16xf32>
    %cst_114 = arith.constant dense<0.000000e+00> : vector<2x4xf32>
    %246 = tpu.matmul %243, %181, %cst_114 {dimension_numbers = #tpu.dot_dimension_numbers<[1], [0], [0], [1], [0, 0, 1, 1], [], []>} : vector<2x16xf32>, vector<16x4xf32>, vector<2x4xf32> -> vector<2x4xf32>
    %247 = vector.broadcast %182 : vector<1x4xf32> to vector<2x4xf32>
    %248 = arith.addf %246, %247 : vector<2x4xf32>
    %c1_115 = arith.constant 1 : index
    %c0_116 = arith.constant 0 : index
    %c0_117 = arith.constant 0 : index
    %249 = vector.load %arg25[%c1_115, %c0_116, %c0_117] : memref<4x2x4xf32, #tpu.memory_space<vmem>>, vector<1x2x4xf32>
    %250 = vector.shape_cast %249 : vector<1x2x4xf32> to vector<2x4xf32>
    %251 = vector.shape_cast %248 : vector<2x4xf32> to vector<1x2x4xf32>
    tpu.vector_store %arg25[%c1_115, %c0_116, %c0_117], %251 {strides = array<i32>} : memref<4x2x4xf32, #tpu.memory_space<vmem>>, vector<1x2x4xf32>,
    %cst_118 = arith.constant dense<0.000000e+00> : vector<2x16xf32>
    %252 = tpu.matmul %240, %173, %cst_118 {dimension_numbers = #tpu.dot_dimension_numbers<[1], [0], [0], [1], [0, 0, 1, 1], [], []>} : vector<2x16xf32>, vector<16x16xf32>, vector<2x16xf32> -> vector<2x16xf32>
    %253 = vector.broadcast %174 : vector<1x16xf32> to vector<2x16xf32>
    %254 = arith.addf %252, %253 : vector<2x16xf32>
    %cst_119 = arith.constant 0.000000e+00 : f32
    %255 = vector.broadcast %cst_119 : f32 to vector<2x16xf32>
    %256 = arith.maximumf %254, %255 : vector<2x16xf32>
    %cst_120 = arith.constant dense<0.000000e+00> : vector<2x16xf32>
    %257 = tpu.matmul %256, %175, %cst_120 {dimension_numbers = #tpu.dot_dimension_numbers<[1], [0], [0], [1], [0, 0, 1, 1], [], []>} : vector<2x16xf32>, vector<16x16xf32>, vector<2x16xf32> -> vector<2x16xf32>
    %258 = vector.broadcast %176 : vector<1x16xf32> to vector<2x16xf32>
    %259 = arith.addf %257, %258 : vector<2x16xf32>
    %260 = math.tanh %259 : vector<2x16xf32>
    %cst_121 = arith.constant dense<0.000000e+00> : vector<2x16xf32>
    %261 = tpu.matmul %243, %177, %cst_121 {dimension_numbers = #tpu.dot_dimension_numbers<[1], [0], [0], [1], [0, 0, 1, 1], [], []>} : vector<2x16xf32>, vector<16x16xf32>, vector<2x16xf32> -> vector<2x16xf32>
    %262 = vector.broadcast %178 : vector<1x16xf32> to vector<2x16xf32>
    %263 = arith.addf %261, %262 : vector<2x16xf32>
    %cst_122 = arith.constant 0.000000e+00 : f32
    %264 = vector.broadcast %cst_122 : f32 to vector<2x16xf32>
    %265 = arith.maximumf %263, %264 : vector<2x16xf32>
    %cst_123 = arith.constant dense<0.000000e+00> : vector<2x64xf32>
    %266 = tpu.matmul %265, %179, %cst_123 {dimension_numbers = #tpu.dot_dimension_numbers<[1], [0], [0], [1], [0, 0, 1, 1], [], []>} : vector<2x16xf32>, vector<16x64xf32>, vector<2x64xf32> -> vector<2x64xf32>
    %267 = vector.broadcast %180 : vector<1x64xf32> to vector<2x64xf32>
    %268 = arith.addf %266, %267 : vector<2x64xf32>
    %269 = math.tanh %268 : vector<2x64xf32>
    %270 = arith.mulf %269, %172 : vector<2x64xf32>
    %cst_124 = arith.constant dense<0.000000e+00> : vector<2x16xf32>
    %271 = tpu.matmul %270, %0, %cst_124 {dimension_numbers = #tpu.dot_dimension_numbers<[1], [0], [0], [1], [0, 0, 1, 1], [], []>} : vector<2x64xf32>, vector<64x16xf32>, vector<2x16xf32> -> vector<2x16xf32>
    %272 = vector.broadcast %171 : f32 to vector<2x16xf32>
    %273 = arith.mulf %260, %272 : vector<2x16xf32>
    %274 = arith.addf %240, %273 : vector<2x16xf32>
    %275 = vector.broadcast %171 : f32 to vector<2x16xf32>
    %276 = arith.mulf %271, %275 : vector<2x16xf32>
    %277 = arith.addf %243, %276 : vector<2x16xf32>
    %278 = arith.mulf %260, %260 : vector<2x16xf32>
    %279 = arith.addf %245, %278 : vector<2x16xf32>
    %cst_125 = arith.constant dense<0.000000e+00> : vector<2x4xf32>
    %280 = tpu.matmul %277, %181, %cst_125 {dimension_numbers = #tpu.dot_dimension_numbers<[1], [0], [0], [1], [0, 0, 1, 1], [], []>} : vector<2x16xf32>, vector<16x4xf32>, vector<2x4xf32> -> vector<2x4xf32>
    %281 = vector.broadcast %182 : vector<1x4xf32> to vector<2x4xf32>
    %282 = arith.addf %280, %281 : vector<2x4xf32>
    %c2_126 = arith.constant 2 : index
    %c0_127 = arith.constant 0 : index
    %c0_128 = arith.constant 0 : index
    %283 = vector.load %arg25[%c2_126, %c0_127, %c0_128] : memref<4x2x4xf32, #tpu.memory_space<vmem>>, vector<1x2x4xf32>
    %284 = vector.shape_cast %283 : vector<1x2x4xf32> to vector<2x4xf32>
    %285 = vector.shape_cast %282 : vector<2x4xf32> to vector<1x2x4xf32>
    tpu.vector_store %arg25[%c2_126, %c0_127, %c0_128], %285 {strides = array<i32>} : memref<4x2x4xf32, #tpu.memory_space<vmem>>, vector<1x2x4xf32>,
    %cst_129 = arith.constant dense<0.000000e+00> : vector<2x16xf32>
    %286 = tpu.matmul %274, %173, %cst_129 {dimension_numbers = #tpu.dot_dimension_numbers<[1], [0], [0], [1], [0, 0, 1, 1], [], []>} : vector<2x16xf32>, vector<16x16xf32>, vector<2x16xf32> -> vector<2x16xf32>
    %287 = vector.broadcast %174 : vector<1x16xf32> to vector<2x16xf32>
    %288 = arith.addf %286, %287 : vector<2x16xf32>
    %cst_130 = arith.constant 0.000000e+00 : f32
    %289 = vector.broadcast %cst_130 : f32 to vector<2x16xf32>
    %290 = arith.maximumf %288, %289 : vector<2x16xf32>
    %cst_131 = arith.constant dense<0.000000e+00> : vector<2x16xf32>
    %291 = tpu.matmul %290, %175, %cst_131 {dimension_numbers = #tpu.dot_dimension_numbers<[1], [0], [0], [1], [0, 0, 1, 1], [], []>} : vector<2x16xf32>, vector<16x16xf32>, vector<2x16xf32> -> vector<2x16xf32>
    %292 = vector.broadcast %176 : vector<1x16xf32> to vector<2x16xf32>
    %293 = arith.addf %291, %292 : vector<2x16xf32>
    %294 = math.tanh %293 : vector<2x16xf32>
    %cst_132 = arith.constant dense<0.000000e+00> : vector<2x16xf32>
    %295 = tpu.matmul %277, %177, %cst_132 {dimension_numbers = #tpu.dot_dimension_numbers<[1], [0], [0], [1], [0, 0, 1, 1], [], []>} : vector<2x16xf32>, vector<16x16xf32>, vector<2x16xf32> -> vector<2x16xf32>
    %296 = vector.broadcast %178 : vector<1x16xf32> to vector<2x16xf32>
    %297 = arith.addf %295, %296 : vector<2x16xf32>
    %cst_133 = arith.constant 0.000000e+00 : f32
    %298 = vector.broadcast %cst_133 : f32 to vector<2x16xf32>
    %299 = arith.maximumf %297, %298 : vector<2x16xf32>
    %cst_134 = arith.constant dense<0.000000e+00> : vector<2x64xf32>
    %300 = tpu.matmul %299, %179, %cst_134 {dimension_numbers = #tpu.dot_dimension_numbers<[1], [0], [0], [1], [0, 0, 1, 1], [], []>} : vector<2x16xf32>, vector<16x64xf32>, vector<2x64xf32> -> vector<2x64xf32>
    %301 = vector.broadcast %180 : vector<1x64xf32> to vector<2x64xf32>
    %302 = arith.addf %300, %301 : vector<2x64xf32>
    %303 = math.tanh %302 : vector<2x64xf32>
    %304 = arith.mulf %303, %172 : vector<2x64xf32>
    %cst_135 = arith.constant dense<0.000000e+00> : vector<2x16xf32>
    %305 = tpu.matmul %304, %0, %cst_135 {dimension_numbers = #tpu.dot_dimension_numbers<[1], [0], [0], [1], [0, 0, 1, 1], [], []>} : vector<2x64xf32>, vector<64x16xf32>, vector<2x16xf32> -> vector<2x16xf32>
    %306 = vector.broadcast %171 : f32 to vector<2x16xf32>
    %307 = arith.mulf %305, %306 : vector<2x16xf32>
    %308 = arith.addf %277, %307 : vector<2x16xf32>
    %309 = arith.mulf %294, %294 : vector<2x16xf32>
    %310 = arith.addf %279, %309 : vector<2x16xf32>
    %cst_136 = arith.constant dense<0.000000e+00> : vector<2x4xf32>
    %311 = tpu.matmul %308, %181, %cst_136 {dimension_numbers = #tpu.dot_dimension_numbers<[1], [0], [0], [1], [0, 0, 1, 1], [], []>} : vector<2x16xf32>, vector<16x4xf32>, vector<2x4xf32> -> vector<2x4xf32>
    %312 = vector.broadcast %182 : vector<1x4xf32> to vector<2x4xf32>
    %313 = arith.addf %311, %312 : vector<2x4xf32>
    %c3_137 = arith.constant 3 : index
    %c0_138 = arith.constant 0 : index
    %c0_139 = arith.constant 0 : index
    %314 = vector.load %arg25[%c3_137, %c0_138, %c0_139] : memref<4x2x4xf32, #tpu.memory_space<vmem>>, vector<1x2x4xf32>
    %315 = vector.shape_cast %314 : vector<1x2x4xf32> to vector<2x4xf32>
    %316 = vector.shape_cast %313 : vector<2x4xf32> to vector<1x2x4xf32>
    tpu.vector_store %arg25[%c3_137, %c0_138, %c0_139], %316 {strides = array<i32>} : memref<4x2x4xf32, #tpu.memory_space<vmem>>, vector<1x2x4xf32>,
    %317 = vector.shape_cast %310 : vector<2x16xf32> to vector<1x2x16xf32>
    %cst_140 = arith.constant dense<0.000000e+00> : vector<1xf32>
    %318 = vector.multi_reduction <add>, %317, %cst_140 [1, 2] : vector<1x2x16xf32> to vector<1xf32>
    %319 = vector.shape_cast %318 : vector<1xf32> to vector<1x1x1xf32>
    %320 = vector.extract %319[0, 0, 0] : f32 from vector<1x1x1xf32>
    %321 = vector.broadcast %320 : f32 to vector<1x1xf32>
    %cst_141 = arith.constant 0.00999999977 : f32
    %322 = arith.mulf %cst_141, %171 : f32
    %cst_142 = arith.constant 3.200000e+01 : f32
    %323 = arith.divf %322, %cst_142 : f32
    %324 = vector.broadcast %323 : f32 to vector<1x1xf32>
    %325 = arith.mulf %321, %324 : vector<1x1xf32>
    %c0_143 = arith.constant 0 : index
    %c0_144 = arith.constant 0 : index
    %326 = vector.load %arg26[%c0_143, %c0_144] : memref<1x1xf32, #tpu.memory_space<vmem>>, vector<1x1xf32>
    tpu.vector_store %arg26[%c0_143, %c0_144], %325 {strides = array<i32>} : memref<1x1xf32, #tpu.memory_space<vmem>>, vector<1x1xf32>,
    return
  }
}

</mosaic_0001>

<bundles_post_ra>
// kernel: neural_cde_forward.1
= control target key start
LH: loop header
LB: loop body
LE: loop exit
PB: predicated region body
PF: predicated region fallthrough
CT: control target
= control target key end

     0   :  { %s5634_s0 = inlined_call_operand.vmem [shape: f32[7], index: 0, kind: input, shape index: {}]   ;;  %s5635_s1 = inlined_call_operand.<no memory space> [shape: f32[1], index: 1, kind: input, shape index: {}]   ;;  %s5636_s2 = inlined_call_operand.vmem [shape: s32[2,1], index: 2, kind: input, shape index: {}]   ;;  %s5637_s3 = inlined_call_operand.vmem [shape: f32[2,4], index: 3, kind: input, shape index: {}]   ;;  %s5638_s4 = inlined_call_operand.vmem [shape: f32[7,2,64], index: 4, kind: input, shape index: {}]   ;;  %s5639_s5 = inlined_call_operand.vmem [shape: f32[2,64], index: 5, kind: input, shape index: {}]   ;;  %s5640_s6 = inlined_call_operand.vmem [shape: f32[64,16], index: 6, kind: input, shape index: {}]   ;;  %s5641_s7 = inlined_call_operand.vmem [shape: f32[4,16], index: 7, kind: input, shape index: {}]   ;;  %s5642_s8 = inlined_call_operand.vmem [shape: f32[1,16], index: 8, kind: input, shape index: {}]   ;;  %s5643_s9 = inlined_call_operand.vmem [shape: f32[16,16], index: 9, kind: input, shape index: {}]   ;;  %s5644_s10 = inlined_call_operand.vmem [shape: f32[1,16], index: 10, kind: input, shape index: {}]   ;;  %s5645_s11 = inlined_call_operand.vmem [shape: f32[16,4], index: 11, kind: input, shape index: {}]   ;;  %s5646_s12 = inlined_call_operand.vmem [shape: f32[1,4], index: 12, kind: input, shape index: {}]   ;;  %s5647_s13 = inlined_call_operand.vmem [shape: f32[16,16], index: 13, kind: input, shape index: {}]   ;;  %s5648_s14 = inlined_call_operand.vmem [shape: f32[1,16], index: 14, kind: input, shape index: {}]   ;;  %s5649_s15 = inlined_call_operand.vmem [shape: f32[16,64], index: 15, kind: input, shape index: {}]   ;;  %s5650_s16 = inlined_call_operand.vmem [shape: f32[1,64], index: 16, kind: input, shape index: {}]   ;;  %s5651_s17 = inlined_call_operand.vmem [shape: f32[16,16], index: 17, kind: input, shape index: {}]   ;;  %s5652_s18 = inlined_call_operand.vmem [shape: f32[1,16], index: 18, kind: input, shape index: {}]   ;;  %s5653_s19 = inlined_call_operand.vmem [shape: f32[16,16], index: 19, kind: input, shape index: {}]   ;;  %s5654_s20 = inlined_call_operand.vmem [shape: f32[1,16], index: 20, kind: input, shape index: {}]   ;;  %s5655_s21 = inlined_call_operand.vmem [shape: f32[16,16], index: 21, kind: input, shape index: {}]   ;;  %s5656_s22 = inlined_call_operand.vmem [shape: f32[1,16], index: 22, kind: input, shape index: {}]   ;;  %s5657_s23 = inlined_call_operand.vmem [shape: f32[16,64], index: 23, kind: input, shape index: {}]   ;;  %s5658_s24 = inlined_call_operand.vmem [shape: f32[1,64], index: 24, kind: input, shape index: {}]   ;;  %s5659_s25 = inlined_call_operand.vmem [shape: f32[4,2,4], index: 25, kind: output, shape index: {0}]   ;;  %s5660_s26 = inlined_call_operand.hbm [shape: f32[1,1], index: 26, kind: output, shape index: {1}]  }
   0x1   :  { %5665 = sst [smem:[#allocation9_spill]] %s5634_s0 }
   0x2   :  { %5666 = sst [smem:[#allocation10_spill]] %s5635_s1 }
   0x3   :  { %5667 = sst [smem:[#allocation11_spill]] %s5636_s2 }
   0x4   :  { %5668 = sst [smem:[#allocation12_spill]] %s5637_s3 }
   0x5   :  { %5669 = sst [smem:[#allocation13_spill]] %s5638_s4 }
   0x6   :  { %5670 = sst [smem:[#allocation14_spill]] %s5639_s5 }
   0x7   :  { %5671 = sst [smem:[#allocation15_spill]] %s5640_s6 }
   0x8   :  { %5672 = sst [smem:[#allocation16_spill]] %s5641_s7 }
   0x9   :  { %5673 = sst [smem:[#allocation17_spill]] %s5642_s8 }
   0xa   :  { %5674 = sst [smem:[#allocation18_spill]] %s5643_s9 }
   0xb   :  { %5675 = sst [smem:[#allocation19_spill]] %s5644_s10 }
   0xc   :  { %33 = vsyncpa [#allocation5], 0 }
   0xd   :  { %34 = vsyncpa [#allocation4], 0  ;;  %s5676_s7 = sld [smem:[#allocation9_spill]] }
  0x13   :  { %s41_s28 = sshll.u32 %s5676_s7, 4  ;;  %s42_s28 = int_to_ptr.vmem [resolvable:$true] %s41_s28 }
  0x14   :  { %s4830_s8 = scalar_lea.vmem %s42_s28, 16  ;;  %p4835_p1 = scmp.lt.s32.totalorder %s42_s28, %s42_s28 }
  0x15   :  { %p4831_p0 = scmp.ne.s32.totalorder %s42_s28, %s4830_s8  ;;  %p4836_p2 = scmp.lt.s32.totalorder %s4830_s8, %s4830_s8 }
  0x17   :  { %p4837_p3 = por %p4836_p2, %p4835_p1 }
  0x19   :  { %p4838_p4 = pnand %p4837_p3, %p4831_p0 }
  0x1b   :  { %4841 = shalt.err (!%p4838_p4)
}
  0x1c   :  { %s4868_s4 = smov [#allocation3]  }
  0x1d   :  { %44 = dma.vmem_to_smem %s42_s28, 16, %s4868_s4, [#allocation5]  }
  0x1e   :  { %4864 = dma.done.wait [#allocation5], 16  }
  0x1f   :  { %4865 = vsyncadd [#allocation5], 4294967280 }
  0x20   :  { %96 = sfence }
  0x21   :  { %s5677_s9 = sld [smem:[#allocation16_spill]]  ;;  %vm119_vm0 = vcmask 1043456   ;;  %vm115_vm1 = vcmask 31744   ;;  %v4869_v1 = vmov 0.0   ;;  %vm4870_vm2 = vmmov 0   ;;  %s5678_s5 = sld [smem:[#allocation12_spill]] }
  0x22   :  { %4094 = vmatprep.subr.mxu0 %v4869_v1  ;;  %4096 = vmatprep.mubr.msk.f32.mxu0 %vm4870_vm2, %v4869_v1  ;;  %v193_v3 = vld [vmem:[%s5647_s13] sm:$0xff]  ;;  %v194_v4 = vld [vmem:[%s5647_s13 + $0x8] sm:$0xff]  ;;  %v4871_v6 = vmov 0.0|0.0   ;;  %s5679_s7 = sld [smem:[#allocation17_spill]]  ;;  %vm205_vm3 = vcmask 130048   ;;  %s5680_s2 = sld [smem:[#allocation15_spill]] }
  0x23   :  { %v5027_v5 = vpack.c.bf16 %v194_v4, %v193_v3  ;;  %4559 = vmatprep.subr.bf16.mxu1 %v4871_v6  ;;  %4129 = vmatprep.mubr.msk.f32.mxu1 %vm4870_vm2, %v4869_v1  ;;  %v196_v11 = vld [vmem:[%s5649_s15] sm:$0xff]  ;;  %v197_v12 = vld [vmem:[%s5649_s15 + $0x8] sm:$0xff]  ;;  %s5681_s30 = sld [smem:[#allocation11_spill]]  ;;  %v4872_v32 = vmov 0   ;;  %s5682_s6 = sld [smem:[#allocation13_spill]]  ;;  %vm362_vm5 = vcmask 523264  }
  0x24   :  { %v5052_v13 = vpack.c.bf16 %v197_v12, %v196_v11  ;;  %v5059_v14 = vld [vmem:[%s5648_s14] ss:$0 sm:$0xff]  ;;  %4798 = vset.pattern.permute.xlu0 %v4872_v32  ;;  %4799 = vset.pattern.permute.xlu1 %v4872_v32  ;;  %s3828_s13 = sld [smem:[#allocation3 + $0x1]]  ;;  %s3833_s28 = sld [smem:[#allocation3 + $0x2]] }
  0x25   :  { %v5119_v34 = vld [vmem:[%s5650_s16] ss:$0 sm:$0xff]  ;;  %s436_s16 = sld [smem:[#allocation3]]  ;;  %s3838_s29 = sld [smem:[#allocation3 + $0x3]] }
  0x26   :  { %s3843_s15 = sld [smem:[#allocation3 + $0x4]]  ;;  %s3848_s14 = sld [smem:[#allocation3 + $0x5]] }
  0x27   :  { %v107_v0 = vld [vmem:[%s5677_s9] sm:$0xf]  ;;  %s5683_s27 = sld [smem:[#allocation18_spill]]  ;;  %s5684_s0 = sld [smem:[#allocation19_spill]] }
  0x28   :  { %v106_v2 = vld [vmem:[%s5678_s5] sm:$0x3]  ;;  %4095 = vmatpush3.msk.msra.mxu0 %vm119_vm0, %v107_v0  ;;  %v98_v20 = vld [vmem:[%s5680_s2 + $0x8] sm:$0xff]  ;;  %v99_v22 = vld [vmem:[%s5680_s2 + $0x10] sm:$0xff]  ;;  %s5685_s8 = sld [smem:[#allocation14_spill]]  ;;  %s4873_s3 = smov [#allocation6]  }
  0x29   :  { %4097 = vmatmul.mubr.msk.f32.vlgmr.msra.gmra.mrb[0].mxu0 %vm115_vm1, %v106_v2  ;;  %4553 = vmatprep.subr.bf16.mxu0 %v4871_v6  ;;  %v3816_v7 = vld [vmem:[%s5679_s7] ss:$0 sm:$0xff]  ;;  %v100_v23 = vld [vmem:[%s5680_s2 + $0x18] sm:$0xff]  ;;  %v102_v26 = vld [vmem:[%s5680_s2 + $0x28] sm:$0xff] }
  0x2a   :  { %4555 = vmatpush3.bf16.msra.mxu0 %v5027_v5  ;;  %4103 = vmatprep.mubr.msk.f32.mxu0 %vm4870_vm2, %v4869_v1  ;;  %v97_v19 = vld [vmem:[%s5680_s2] sm:$0xff]  ;;  %v5083_v24 = vpack.c.bf16 %v100_v23, %v99_v22  ;;  %v103_v28 = vld [vmem:[%s5680_s2 + $0x30] sm:$0xff]  ;;  %v104_v29 = vld [vmem:[%s5680_s2 + $0x38] sm:$0xff]  ;;  %v672_v57 = vstv %s3828_s13 }
  0x2b   :  { %4556 = vmatprep.subr.bf16.mxu0 %v4871_v6  ;;  %v5073_v21 = vpack.c.bf16 %v98_v20, %v97_v19  ;;  %v101_v25 = vld [vmem:[%s5680_s2 + $0x20] sm:$0xff]  ;;  %v5102_v30 = vpack.c.bf16 %v104_v29, %v103_v28  ;;  %v437_v41 = vstv %s436_s16  ;;  %s5686_s2 = sld [smem:[#allocation10_spill]] }
  0x2c   :  { %v5092_v27 = vpack.c.bf16 %v102_v26, %v101_v25  ;;  %v5110_v31 = vld [vmem:[%s5681_s30] sm:$0x3]  ;;  %v3826_v54 = vld [vmem:[%s5682_s6 + $0x2] sm:$0x3] }
  0x2d   :  { %4561 = vmatpush3.bf16.msra.mxu1 %v5073_v21  ;;  %vm440_vm4 = vcmp.eq.s32.totalorder %v5110_v31, 1  ;;  %v360_v38 = vld [vmem:[%s5682_s6] sm:$0x3]  ;;  %vm675_vm6 = vcmp.eq.s32.totalorder %v5110_v31, 2  ;;  %vm910_vm7 = vcmp.eq.s32.totalorder %v5110_v31, 3  ;;  %vm1145_vm8 = vcmp.eq.s32.totalorder %v5110_v31, 4 }
  0x2e   :  { %4562 = vmatprep.subr.bf16.mxu1 %v4871_v6  ;;  %v441_v33 = vsel %vm440_vm4, 1, %v4872_v32  ;;  %v676_v50 = vsel %vm675_vm6, 1, %v4872_v32  ;;  %v911_v3 = vsel %vm910_vm7, 1, %v4872_v32  ;;  %v1146_v26 = vsel %vm1145_vm8, 1, %v4872_v32 }
  0x2f   :  { %443 = vperm.xlu0 %4798, %v441_v33   ;;  %913 = vperm.xlu1 %4799, %v911_v3   ;;  %vm1380_vm9 = vcmp.eq.s32.totalorder %v5110_v31, 5  ;;  %vm1615_vm10 = vcmp.eq.s32.totalorder %v5110_v31, 6  ;;  %vm1850_vm11 = vcmp.eq.s32.totalorder %v5110_v31, 7  ;;  %v1857_v31 = vld [vmem:[%s5683_s27] sm:$0xff]  ;;  %vm2433_vm6 = vcmask 25600  }
  0x30   :  { %vm3777_vm7 = vcmask 123904  }
  0x31   :  { %4564 = vmatpush3.bf16.msra.mxu1 %v5083_v24 }
  0x32   :  { %4565 = vmatprep.subr.bf16.mxu1 %v4871_v6 }
  0x33   :  { %678 = vperm.xlu0 %4798, %v676_v50   ;;  %1148 = vperm.xlu1 %4799, %v1146_v26  }
  0x35   :  { %4567 = vmatpush3.bf16.msra.mxu1 %v5092_v27 }
  0x36   :  { %4568 = vmatprep.subr.bf16.mxu1 %v4871_v6 }
  0x39   :  { %4570 = vmatpush3.bf16.msra.mxu1 %v5102_v30 }
  0x3a   :  { %4589 = vmatprep.subr.bf16.mxu1 %v4871_v6 }
  0xfc   :  { %v189_v8 = vpop.f32.mrb[0].mxu0 }
  0xfd   :  { %v5040_v9 = vadd.f32 %v3816_v7, %v189_v8  ;;  %v4098_v10 = vpop.f32.mrb[1].mxu0 }
  0xfe   :  { %v3831_v10 = vld [vmem:[%s5682_s6 + $0x4] sm:$0x3] }
  0xff   :  { %4104 = vmatmul.mubr.msk.f32.vlgmr.msra.gmra.mrb[2].mxu0 %vm205_vm3, %v5040_v9 }
 0x100   :  { %4110 = vmatprep.mubr.msk.f32.mxu0 %vm4870_vm2, %v4869_v1  ;;  %4558 = vmatpush3.bf16.msra.mxu0 %v5052_v13 }
 0x101   :  { %4571 = vmatprep.subr.bf16.mxu0 %v4871_v6 }
 0x1d2   :  { %v275_v15 = vpop.f32.mrb[2].mxu0 }
 0x1d3   :  { %v276_v16 = vadd.f32 %v5059_v14, %v275_v15  ;;  %v4105_v17 = vpop.f32.mrb[3].mxu0  ;;  %v907_v15 = vstv %s3833_s28 }
 0x1d5   :  { %v279_v18 = vmax.f32 %v276_v16, 0.0 }
 0x1d7   :  { %4111 = vmatmul.mubr.msk.f32.vlgmr.msra.gmra.mrb[4].mxu0 %vm205_vm3, %v279_v18 }
 0x1d8   :  { %4573 = vmatpush3.bf16.msra.mxu0 %v5027_v5  ;;  %4136 = vmatprep.mubr.msk.f32.mxu0 %vm4870_vm2, %v4869_v1 }
 0x1d9   :  { %4574 = vmatprep.subr.bf16.mxu0 %v4871_v6 }
 0x2aa   :  { %v355_v35 = vpop.f32.mrb[4].mxu0 }
 0x2ab   :  { %v356_v36 = vadd.f32 %v5119_v34, %v355_v35  ;;  %v4112_v37 = vpop.f32.mrb[5].mxu0  ;;  %v3836_v35 = vld [vmem:[%s5682_s6 + $0x6] sm:$0x3] }
 0x2ad   :  { %4800 = vtanh.f32 %v356_v36 }
 0x2b7   :  { %v4801_v39 = vpop.eup %4800 }
 0x2b8   :  { %v361_v40 = vmul.f32 %v4801_v39, %v360_v38  ;;  %v1142_v38 = vstv %s3838_s29 }
 0x2ba   :  { %4130 = vmatmul.mubr.msk.f32.vlgmr.msra.gmra.mrb[0].mxu1 %vm362_vm5, %v361_v40 }
 0x2bb   :  { %4591 = vmatpush3.bf16.msra.mxu1 %v5027_v5  ;;  %4169 = vmatprep.mubr.msk.f32.mxu1 %vm4870_vm2, %v4869_v1 }
 0x2bc   :  { %4592 = vmatprep.subr.bf16.mxu1 %v4871_v6 }
 0x38d   :  { %v432_v42 = vpop.f32.mrb[0].mxu1 }
 0x38e   :  { %v438_v43 = vmul.f32 %v437_v41, %v432_v42  ;;  %v4131_v44 = vpop.f32.mrb[1].mxu1 }
 0x390   :  { %v5131_v45 = vadd.f32 %v438_v43, %v5040_v9 }
 0x392   :  { %4137 = vmatmul.mubr.msk.f32.vlgmr.msra.gmra.mrb[6].mxu0 %vm205_vm3, %v5131_v45 }
 0x393   :  { %4576 = vmatpush3.bf16.msra.mxu0 %v5052_v13  ;;  %4143 = vmatprep.mubr.msk.f32.mxu0 %vm4870_vm2, %v4869_v1 }
 0x394   :  { %4577 = vmatprep.subr.bf16.mxu0 %v4871_v6 }
 0x465   :  { %v516_v46 = vpop.f32.mrb[6].mxu0 }
 0x466   :  { %v517_v47 = vadd.f32 %v5059_v14, %v516_v46  ;;  %v4138_v48 = vpop.f32.mrb[7].mxu0 }
 0x467   :  { %v1381_v48 = vsel %vm1380_vm9, 1, %v4872_v32 }
 0x468   :  { %v520_v49 = vmax.f32 %v517_v47, 0.0  ;;  %1383 = vperm.xlu0 %4798, %v1381_v48   ;;  %v1942_v48 = vld [vmem:[%s5651_s17 + $0x8] sm:$0xff] }
 0x46a   :  { %4144 = vmatmul.mubr.msk.f32.vlgmr.msra.gmra.mrb[8].mxu0 %vm205_vm3, %v520_v49 }
 0x46b   :  { %4579 = vmatpush3.bf16.msra.mxu0 %v5073_v21  ;;  %4162 = vmatprep.mubr.msk.f32.mxu0 %vm4870_vm2, %v4869_v1 }
 0x46c   :  { %4580 = vmatprep.subr.bf16.mxu0 %v4871_v6 }
 0x46f   :  { %4582 = vmatpush3.bf16.msra.mxu0 %v5083_v24 }
 0x470   :  { %4583 = vmatprep.subr.bf16.mxu0 %v4871_v6 }
 0x473   :  { %4585 = vmatpush3.bf16.msra.mxu0 %v5092_v27 }
 0x474   :  { %4586 = vmatprep.subr.bf16.mxu0 %v4871_v6 }
 0x477   :  { %4588 = vmatpush3.bf16.msra.mxu0 %v5102_v30 }
 0x478   :  { %4607 = vmatprep.subr.bf16.mxu0 %v4871_v6 }
 0x53d   :  { %v590_v51 = vpop.f32.mrb[8].mxu0 }
 0x53e   :  { %v591_v52 = vadd.f32 %v5119_v34, %v590_v51  ;;  %v4145_v53 = vpop.f32.mrb[9].mxu0 }
 0x540   :  { %4802 = vtanh.f32 %v591_v52  ;;  %v3841_v52 = vld [vmem:[%s5682_s6 + $0x8] sm:$0x3] }
 0x54a   :  { %v4803_v55 = vpop.eup %4802 }
 0x54b   :  { %v597_v56 = vmul.f32 %v4803_v55, %v3826_v54  ;;  %v1377_v55 = vstv %s3843_s15 }
 0x54d   :  { %4163 = vmatmul.mubr.msk.f32.vlgmr.msra.gmra.mrb[10].mxu0 %vm362_vm5, %v597_v56 }
 0x54e   :  { %4609 = vmatpush3.bf16.msra.mxu0 %v5027_v5  ;;  %4202 = vmatprep.mubr.msk.f32.mxu0 %vm4870_vm2, %v4869_v1 }
 0x54f   :  { %4610 = vmatprep.subr.bf16.mxu0 %v4871_v6 }
 0x620   :  { %v667_v58 = vpop.f32.mrb[10].mxu0 }
 0x621   :  { %v673_v59 = vmul.f32 %v672_v57, %v667_v58  ;;  %v4164_v60 = vpop.f32.mrb[11].mxu0 }
 0x623   :  { %v5163_v61 = vadd.f32 %v673_v59, %v5131_v45 }
 0x625   :  { %4170 = vmatmul.mubr.msk.f32.vlgmr.msra.gmra.mrb[2].mxu1 %vm205_vm3, %v5163_v61 }
 0x626   :  { %4594 = vmatpush3.bf16.msra.mxu1 %v5052_v13  ;;  %4176 = vmatprep.mubr.msk.f32.mxu1 %vm4870_vm2, %v4869_v1 }
 0x627   :  { %4595 = vmatprep.subr.bf16.mxu1 %v4871_v6 }
 0x6f8   :  { %v751_v62 = vpop.f32.mrb[2].mxu1 }
 0x6f9   :  { %v752_v63 = vadd.f32 %v5059_v14, %v751_v62  ;;  %v4171_v0 = vpop.f32.mrb[3].mxu1 }
 0x6fa   :  { %v1616_v0 = vsel %vm1615_vm10, 1, %v4872_v32 }
 0x6fb   :  { %v755_v2 = vmax.f32 %v752_v63, 0.0  ;;  %1618 = vperm.xlu1 %4799, %v1616_v0   ;;  %v1948_v0 = vld [vmem:[%s5655_s21 + $0x8] sm:$0xff] }
 0x6fd   :  { %4177 = vmatmul.mubr.msk.f32.vlgmr.msra.gmra.mrb[4].mxu1 %vm205_vm3, %v755_v2 }
 0x6fe   :  { %4597 = vmatpush3.bf16.msra.mxu1 %v5073_v21  ;;  %4195 = vmatprep.mubr.msk.f32.mxu1 %vm4870_vm2, %v4869_v1 }
 0x6ff   :  { %4598 = vmatprep.subr.bf16.mxu1 %v4871_v6 }
 0x702   :  { %4600 = vmatpush3.bf16.msra.mxu1 %v5083_v24 }
 0x703   :  { %4601 = vmatprep.subr.bf16.mxu1 %v4871_v6 }
 0x706   :  { %4603 = vmatpush3.bf16.msra.mxu1 %v5092_v27 }
 0x707   :  { %4604 = vmatprep.subr.bf16.mxu1 %v4871_v6 }
 0x70a   :  { %4606 = vmatpush3.bf16.msra.mxu1 %v5102_v30 }
 0x70b   :  { %4625 = vmatprep.subr.bf16.mxu1 %v4871_v6 }
 0x7d0   :  { %v825_v4 = vpop.f32.mrb[4].mxu1 }
 0x7d1   :  { %v826_v7 = vadd.f32 %v5119_v34, %v825_v4  ;;  %v4178_v8 = vpop.f32.mrb[5].mxu1 }
 0x7d3   :  { %4804 = vtanh.f32 %v826_v7  ;;  %v3846_v7 = vld [vmem:[%s5682_s6 + $0xa] sm:$0x3] }
 0x7dd   :  { %v4805_v11 = vpop.eup %4804 }
 0x7de   :  { %v832_v12 = vmul.f32 %v4805_v11, %v3831_v10  ;;  %v1612_v11 = vstv %s3848_s14 }
 0x7e0   :  { %4196 = vmatmul.mubr.msk.f32.vlgmr.msra.gmra.mrb[6].mxu1 %vm362_vm5, %v832_v12 }
 0x7e1   :  { %4627 = vmatpush3.bf16.msra.mxu1 %v5027_v5  ;;  %4235 = vmatprep.mubr.msk.f32.mxu1 %vm4870_vm2, %v4869_v1 }
 0x7e2   :  { %4628 = vmatprep.subr.bf16.mxu1 %v4871_v6 }
 0x8b3   :  { %v902_v16 = vpop.f32.mrb[6].mxu1 }
 0x8b4   :  { %v908_v17 = vmul.f32 %v907_v15, %v902_v16  ;;  %v4197_v18 = vpop.f32.mrb[7].mxu1 }
 0x8b6   :  { %v5195_v19 = vadd.f32 %v908_v17, %v5163_v61 }
 0x8b8   :  { %4203 = vmatmul.mubr.msk.f32.vlgmr.msra.gmra.mrb[12].mxu0 %vm205_vm3, %v5195_v19 }
 0x8b9   :  { %4612 = vmatpush3.bf16.msra.mxu0 %v5052_v13  ;;  %4209 = vmatprep.mubr.msk.f32.mxu0 %vm4870_vm2, %v4869_v1 }
 0x8ba   :  { %4613 = vmatprep.subr.bf16.mxu0 %v4871_v6 }
 0x98b   :  { %v986_v20 = vpop.f32.mrb[12].mxu0 }
 0x98c   :  { %v987_v22 = vadd.f32 %v5059_v14, %v986_v20  ;;  %v4204_v23 = vpop.f32.mrb[13].mxu0 }
 0x98e   :  { %v990_v25 = vmax.f32 %v987_v22, 0.0 }
 0x990   :  { %4210 = vmatmul.mubr.msk.f32.vlgmr.msra.gmra.mrb[14].mxu0 %vm205_vm3, %v990_v25 }
 0x991   :  { %4615 = vmatpush3.bf16.msra.mxu0 %v5073_v21  ;;  %4228 = vmatprep.mubr.msk.f32.mxu0 %vm4870_vm2, %v4869_v1 }
 0x992   :  { %4616 = vmatprep.subr.bf16.mxu0 %v4871_v6 }
 0x995   :  { %4618 = vmatpush3.bf16.msra.mxu0 %v5083_v24 }
 0x996   :  { %4619 = vmatprep.subr.bf16.mxu0 %v4871_v6 }
 0x999   :  { %4621 = vmatpush3.bf16.msra.mxu0 %v5092_v27 }
 0x99a   :  { %4622 = vmatprep.subr.bf16.mxu0 %v4871_v6 }
 0x99d   :  { %4624 = vmatpush3.bf16.msra.mxu0 %v5102_v30 }
 0x99e   :  { %4643 = vmatprep.subr.bf16.mxu0 %v4871_v6 }
 0xa63   :  { %v1060_v28 = vpop.f32.mrb[14].mxu0 }
 0xa64   :  { %v1061_v29 = vadd.f32 %v5119_v34, %v1060_v28  ;;  %v4211_v33 = vpop.f32.mrb[15].mxu0  ;;  %v3851_v28 = vld [vmem:[%s5682_s6 + $0xc] sm:$0x3]  ;;  %s3853_s6 = sld [smem:[#allocation3 + $0x6]] }
 0xa66   :  { %4806 = vtanh.f32 %v1061_v29 }
 0xa70   :  { %v4807_v36 = vpop.eup %4806 }
 0xa71   :  { %v1067_v37 = vmul.f32 %v4807_v36, %v3836_v35  ;;  %v444_v35 = vpop.permute.xlu0 %443  ;;  %v914_v36 = vpop.permute.xlu1 %913 }
 0xa72   :  { %vm445_vm12 = vcmp.eq.s32.totalorder %v444_v35, 1  ;;  %vm915_vm14 = vcmp.eq.s32.totalorder %v914_v36, 1  ;;  %v5445_v35 = vld [vmem:[%s5654_s20] ss:$0 sm:$0xff] }
 0xa73   :  { %4229 = vmatmul.mubr.msk.f32.vlgmr.msra.gmra.mrb[16].mxu0 %vm362_vm5, %v1067_v37 }
 0xa74   :  { %4645 = vmatpush3.bf16.msra.mxu0 %v5027_v5  ;;  %4268 = vmatprep.mubr.msk.f32.mxu0 %vm4870_vm2, %v4869_v1 }
 0xa75   :  { %4646 = vmatprep.subr.bf16.mxu0 %v4871_v6  ;;  %v679_v37 = vpop.permute.xlu0 %678 }
 0xa76   :  { %vm680_vm13 = vcmp.eq.s32.totalorder %v679_v37, 1 }
 0xb46   :  { %v1137_v39 = vpop.f32.mrb[16].mxu0 }
 0xb47   :  { %v1143_v40 = vmul.f32 %v1142_v38, %v1137_v39  ;;  %v4230_v41 = vpop.f32.mrb[17].mxu0  ;;  %v1149_v38 = vpop.permute.xlu1 %1148 }
 0xb48   :  { %v1384_v39 = vpop.permute.xlu0 %1383  ;;  %v1847_v41 = vstv %s3853_s6  ;;  %vm1150_vm15 = vcmp.eq.s32.totalorder %v1149_v38, 1  ;;  %v5451_v38 = vstv %s5686_s2  ;;  %s3805_s6 = sshll.u32 %s4873_s3, 4  ;;  %s3806_s6 = int_to_ptr.vmem [resolvable:$true] %s3805_s6 }
 0xb49   :  { %v5227_v42 = vadd.f32 %v1143_v40, %v5195_v19  ;;  %vm1385_vm0 = vcmp.eq.s32.totalorder %v1384_v39, 1  ;;  %s4846_s7 = scalar_lea.vmem %s3806_s6, 32  ;;  %p4847_p6 = scmp.lt.s32.totalorder %s3806_s6, %s3806_s6 }
 0xb4b   :  { %4236 = vmatmul.mubr.msk.f32.vlgmr.msra.gmra.mrb[8].mxu1 %vm205_vm3, %v5227_v42  ;;  %v1619_v40 = vpop.permute.xlu1 %1618 }
 0xb4c   :  { %4630 = vmatpush3.bf16.msra.mxu1 %v5052_v13  ;;  %4242 = vmatprep.mubr.msk.f32.mxu1 %vm4870_vm2, %v4869_v1  ;;  %vm1620_vm1 = vcmp.eq.s32.totalorder %v1619_v40, 1 }
 0xb4d   :  { %4631 = vmatprep.subr.bf16.mxu1 %v4871_v6 }
 0xc1e   :  { %v1221_v43 = vpop.f32.mrb[8].mxu1 }
 0xc1f   :  { %v1222_v44 = vadd.f32 %v5059_v14, %v1221_v43  ;;  %v4237_v46 = vpop.f32.mrb[9].mxu1  ;;  %v446_v43 = vsel %vm445_vm12, %v5131_v45, %v5040_v9 }
 0xc21   :  { %v1225_v47 = vmax.f32 %v1222_v44, 0.0  ;;  %v681_v44 = vsel %vm680_vm13, %v5163_v61, %v446_v43 }
 0xc23   :  { %4243 = vmatmul.mubr.msk.f32.vlgmr.msra.gmra.mrb[10].mxu1 %vm205_vm3, %v1225_v47  ;;  %v1941_v47 = vld [vmem:[%s5651_s17] sm:$0xff] }
 0xc24   :  { %4633 = vmatpush3.bf16.msra.mxu1 %v5073_v21  ;;  %4261 = vmatprep.mubr.msk.f32.mxu1 %vm4870_vm2, %v4869_v1 }
 0xc25   :  { %4634 = vmatprep.subr.bf16.mxu1 %v4871_v6 }
 0xc28   :  { %4636 = vmatpush3.bf16.msra.mxu1 %v5083_v24 }
 0xc29   :  { %4637 = vmatprep.subr.bf16.mxu1 %v4871_v6 }
 0xc2c   :  { %4639 = vmatpush3.bf16.msra.mxu1 %v5092_v27 }
 0xc2d   :  { %4640 = vmatprep.subr.bf16.mxu1 %v4871_v6 }
 0xc30   :  { %4642 = vmatpush3.bf16.msra.mxu1 %v5102_v30 }
 0xc31   :  { %4661 = vmatprep.subr.bf16.mxu1 %v4871_v6 }
 0xcf6   :  { %v1295_v49 = vpop.f32.mrb[10].mxu1 }
 0xcf7   :  { %v1296_v50 = vadd.f32 %v5119_v34, %v1295_v49  ;;  %v4244_v51 = vpop.f32.mrb[11].mxu1  ;;  %v916_v49 = vsel %vm915_vm14, %v5195_v19, %v681_v44  ;;  %v3854_v19 = vld [vmem:[%s5684_s0] ss:$0 sm:$0xff] }
 0xcf8   :  { %v1151_v45 = vsel %vm1150_vm15, %v5227_v42, %v916_v49 }
 0xcf9   :  { %4808 = vtanh.f32 %v1296_v50 }
 0xd03   :  { %v4809_v53 = vpop.eup %4808 }
 0xd04   :  { %v1302_v54 = vmul.f32 %v4809_v53, %v3841_v52 }
 0xd06   :  { %4262 = vmatmul.mubr.msk.f32.vlgmr.msra.gmra.mrb[12].mxu1 %vm362_vm5, %v1302_v54  ;;  %v5338_v54 = vpack.c.bf16 %v1942_v48, %v1941_v47 }
 0xd07   :  { %4663 = vmatpush3.bf16.msra.mxu1 %v5027_v5  ;;  %4301 = vmatprep.mubr.msk.f32.mxu1 %vm4870_vm2, %v4869_v1 }
 0xd08   :  { %4664 = vmatprep.subr.bf16.mxu1 %v4871_v6 }
 0xdd9   :  { %v1372_v56 = vpop.f32.mrb[12].mxu1 }
 0xdda   :  { %v1378_v57 = vmul.f32 %v1377_v55, %v1372_v56  ;;  %v4263_v58 = vpop.f32.mrb[13].mxu1 }
 0xddc   :  { %v5259_v59 = vadd.f32 %v1378_v57, %v5227_v42 }
 0xdde   :  { %4269 = vmatmul.mubr.msk.f32.vlgmr.msra.gmra.mrb[18].mxu0 %vm205_vm3, %v5259_v59  ;;  %v1386_v61 = vsel %vm1385_vm0, %v5259_v59, %v1151_v45 }
 0xddf   :  { %4648 = vmatpush3.bf16.msra.mxu0 %v5052_v13  ;;  %4275 = vmatprep.mubr.msk.f32.mxu0 %vm4870_vm2, %v4869_v1 }
 0xde0   :  { %4649 = vmatprep.subr.bf16.mxu0 %v4871_v6 }
 0xeb1   :  { %v1456_v5 = vpop.f32.mrb[18].mxu0 }
 0xeb2   :  { %v1457_v60 = vadd.f32 %v5059_v14, %v1456_v5  ;;  %v4270_v62 = vpop.f32.mrb[19].mxu0  ;;  %v1945_v5 = vld [vmem:[%s5653_s19 + $0x8] sm:$0xff] }
 0xeb3   :  { %v5368_v62 = vld [vmem:[%s5652_s18] ss:$0 sm:$0xff] }
 0xeb4   :  { %v1460_v63 = vmax.f32 %v1457_v60, 0.0 }
 0xeb6   :  { %4276 = vmatmul.mubr.msk.f32.vlgmr.msra.gmra.mrb[20].mxu0 %vm205_vm3, %v1460_v63  ;;  %v1947_v63 = vld [vmem:[%s5655_s21] sm:$0xff] }
 0xeb7   :  { %4651 = vmatpush3.bf16.msra.mxu0 %v5073_v21  ;;  %4294 = vmatprep.mubr.msk.f32.mxu0 %vm4870_vm2, %v4869_v1 }
 0xeb8   :  { %4652 = vmatprep.subr.bf16.mxu0 %v4871_v6 }
 0xebb   :  { %4654 = vmatpush3.bf16.msra.mxu0 %v5083_v24 }
 0xebc   :  { %4655 = vmatprep.subr.bf16.mxu0 %v4871_v6 }
 0xebf   :  { %4657 = vmatpush3.bf16.msra.mxu0 %v5092_v27 }
 0xec0   :  { %4658 = vmatprep.subr.bf16.mxu0 %v4871_v6 }
 0xec3   :  { %4660 = vmatpush3.bf16.msra.mxu0 %v5102_v30 }
 0xec4   :  { %4679 = vmatprep.subr.bf16.mxu0 %v4871_v6 }
 0xf89   :  { %v1530_v2 = vpop.f32.mrb[20].mxu0 }
 0xf8a   :  { %v1531_v3 = vadd.f32 %v5119_v34, %v1530_v2  ;;  %v4277_v4 = vpop.f32.mrb[21].mxu0 }
 0xf8c   :  { %4810 = vtanh.f32 %v1531_v3 }
 0xf96   :  { %v4811_v8 = vpop.eup %4810 }
 0xf97   :  { %v1537_v10 = vmul.f32 %v4811_v8, %v3846_v7  ;;  %v5377_v7 = vpack.c.bf16 %v1948_v0, %v1947_v63 }
 0xf99   :  { %4295 = vmatmul.mubr.msk.f32.vlgmr.msra.gmra.mrb[22].mxu0 %vm362_vm5, %v1537_v10  ;;  %v1950_v10 = vld [vmem:[%s5657_s23] sm:$0xff] }
 0xf9a   :  { %4334 = vmatprep.mubr.msk.f32.mxu0 %vm4870_vm2, %v4869_v1 }
0x106c   :  { %v1607_v12 = vpop.f32.mrb[22].mxu0 }
0x106d   :  { %v1613_v15 = vmul.f32 %v1612_v11, %v1607_v12  ;;  %v4296_v16 = vpop.f32.mrb[23].mxu0  ;;  %v1951_v11 = vld [vmem:[%s5657_s23 + $0x8] sm:$0xff]  ;;  %s4842_s23 = scalar_lea.vmem %s3806_s6, 16 }
0x106e   :  { %v5402_v12 = vpack.c.bf16 %v1951_v11, %v1950_v10  ;;  %p4843_p5 = scmp.ne.s32.totalorder %s3806_s6, %s4842_s23  ;;  %p4848_p7 = scmp.lt.s32.totalorder %s4846_s7, %s4842_s23 }
0x106f   :  { %v5289_v17 = vadd.f32 %v1613_v15, %v5259_v59  ;;  %v1944_v59 = vld [vmem:[%s5653_s19] sm:$0xff]  ;;  %s3789_s19 = smul.f32 0.01, %s5686_s2 }
0x1070   :  { %v5361_v60 = vpack.c.bf16 %v1945_v5, %v1944_v59  ;;  %p4849_p8 = por %p4848_p7, %p4847_p6 }
0x1071   :  { %4302 = vmatmul.mubr.msk.f32.vlgmr.msra.gmra.mrb[14].mxu1 %vm205_vm3, %v5289_v17  ;;  %v1621_v55 = vsel %vm1620_vm1, %v5289_v17, %v1386_v61  ;;  %s3792_s21 = smul.f32 0.03125, %s3789_s19 }
0x1072   :  { %4666 = vmatpush3.bf16.msra.mxu1 %v5052_v13  ;;  %4308 = vmatprep.mubr.msk.f32.mxu1 %vm4870_vm2, %v4869_v1  ;;  %v1851_v13 = vsel %vm1850_vm11, 1, %v4872_v32  ;;  %v1858_v32 = vld [vmem:[%s5683_s27 + $0x8] sm:$0xff]  ;;  %p4850_p9 = pnand %p4849_p8, %p4843_p5 }
0x1073   :  { %4667 = vmatprep.subr.bf16.mxu1 %v4871_v6  ;;  %1853 = vperm.xlu0 %4798, %v1851_v13   ;;  %v5418_v13 = vld [vmem:[%s5658_s24] ss:$0 sm:$0xff] }
0x10f2   :  { %v1854_v50 = vpop.permute.xlu0 %1853 }
0x10f3   :  { %vm1855_vm4 = vcmp.eq.s32.totalorder %v1854_v50, 1 }
0x1144   :  { %v1691_v18 = vpop.f32.mrb[14].mxu1 }
0x1145   :  { %v1692_v20 = vadd.f32 %v5059_v14, %v1691_v18  ;;  %v4303_v22 = vpop.f32.mrb[15].mxu1 }
0x1147   :  { %v1695_v23 = vmax.f32 %v1692_v20, 0.0 }
0x1149   :  { %4309 = vmatmul.mubr.msk.f32.vlgmr.msra.gmra.mrb[16].mxu1 %vm205_vm3, %v1695_v23 }
0x114a   :  { %4669 = vmatpush3.bf16.msra.mxu1 %v5073_v21  ;;  %4327 = vmatprep.mubr.msk.f32.mxu1 %vm4870_vm2, %v4869_v1 }
0x114b   :  { %4670 = vmatprep.subr.bf16.mxu1 %v4871_v6 }
0x114e   :  { %4672 = vmatpush3.bf16.msra.mxu1 %v5083_v24 }
0x114f   :  { %4673 = vmatprep.subr.bf16.mxu1 %v4871_v6 }
0x1152   :  { %4675 = vmatpush3.bf16.msra.mxu1 %v5092_v27 }
0x1153   :  { %4676 = vmatprep.subr.bf16.mxu1 %v4871_v6 }
0x1156   :  { %4678 = vmatpush3.bf16.msra.mxu1 %v5102_v30 }
0x1157   :  { %4691 = vmatprep.subr.bf16.mxu1 %v4871_v6 }
0x121c   :  { %v1765_v14 = vpop.f32.mrb[16].mxu1 }
0x121d   :  { %v1766_v25 = vadd.f32 %v5119_v34, %v1765_v14  ;;  %v4310_v26 = vpop.f32.mrb[17].mxu1  ;;  %v4680_v34 = vpack.c.bf16 %v1858_v32, %v1857_v31  ;;  %v1953_v31 = vld [vmem:[%s5645_s11] sm:$0xff]  ;;  %v1954_v32 = vld [vmem:[%s5645_s11 + $0x8] sm:$0xff] }
0x121f   :  { %4812 = vtanh.f32 %v1766_v25  ;;  %4681 = vmatpush3.bf16.msra.mxu0 %v4680_v34  ;;  %v5438_v34 = vpack.c.bf16 %v1954_v32, %v1953_v31 }
0x1220   :  { %4682 = vmatprep.subr.bf16.mxu0 %v4871_v6 }
0x1229   :  { %v4813_v29 = vpop.eup %4812 }
0x122a   :  { %v1772_v33 = vmul.f32 %v4813_v29, %v3851_v28  ;;  %v5424_v28 = vld [vmem:[%s5685_s8] sm:$0x3] }
0x122c   :  { %4328 = vmatmul.mubr.msk.f32.vlgmr.msra.gmra.mrb[18].mxu1 %vm362_vm5, %v1772_v33 }
0x122d   :  { %4362 = vmatprep.mubr.msk.f32.mxu1 %vm4870_vm2, %v4869_v1  ;;  %4693 = vmatpush3.bf16.msra.mxu1 %v5402_v12 }
0x122e   :  { %4706 = vmatprep.subr.bf16.mxu1 %v4871_v6 }
0x12ff   :  { %v1842_v46 = vpop.f32.mrb[18].mxu1 }
0x1300   :  { %v1848_v51 = vmul.f32 %v1847_v41, %v1842_v46  ;;  %v4329_v52 = vpop.f32.mrb[19].mxu1 }
0x1302   :  { %v1849_v53 = vadd.f32 %v1848_v51, %v5289_v17  ;;  %v5409_v17 = vld [vmem:[%s5656_s22] ss:$0 sm:$0xff] }
0x1304   :  { %v1856_v56 = vsel %vm1855_vm4, %v1849_v53, %v1621_v55 }
0x1305   :  { %4335 = vmatmul.mubr.msk.f32.vlgmr.msra.gmra.mrb[24].mxu0 %vm205_vm3, %v1856_v56 }
0x1306   :  { %4684 = vmatpush3.bf16.msra.mxu0 %v5338_v54  ;;  %4341 = vmatprep.mubr.msk.f32.mxu0 %vm4870_vm2, %v4869_v1 }
0x1307   :  { %4685 = vmatprep.subr.bf16.mxu0 %v4871_v6 }
0x13d8   :  { %v1935_v42 = vpop.f32.mrb[24].mxu0 }
0x13d9   :  { %v5349_v57 = vadd.f32 %v3854_v19, %v1935_v42  ;;  %v4336_v58 = vpop.f32.mrb[25].mxu0 }
0x13db   :  { %4342 = vmatmul.mubr.msk.f32.vlgmr.msra.gmra.mrb[26].mxu0 %vm205_vm3, %v5349_v57 }
0x13dc   :  { %4348 = vmatprep.mubr.msk.f32.mxu0 %vm4870_vm2, %v4869_v1  ;;  %4687 = vmatpush3.bf16.msra.mxu0 %v5361_v60 }
0x13dd   :  { %4688 = vmatprep.subr.bf16.mxu0 %v4871_v6 }
0x14ae   :  { %v2031_v2 = vpop.f32.mrb[26].mxu0 }
0x14af   :  { %v2032_v3 = vadd.f32 %v5368_v62, %v2031_v2  ;;  %v4343_v4 = vpop.f32.mrb[27].mxu0 }
0x14b1   :  { %v2035_v8 = vmax.f32 %v2032_v3, 0.0 }
0x14b3   :  { %4349 = vmatmul.mubr.msk.f32.vlgmr.msra.gmra.mrb[28].mxu0 %vm205_vm3, %v2035_v8 }
0x14b4   :  { %4690 = vmatpush3.bf16.msra.mxu0 %v5377_v7  ;;  %4355 = vmatprep.mubr.msk.f32.mxu0 %vm4870_vm2, %v4869_v1 }
0x14b5   :  { %4694 = vmatprep.subr.bf16.mxu0 %v4871_v6 }
0x14b7   :  { %4356 = vmatmul.mubr.msk.f32.vlgmr.msra.gmra.mrb[30].mxu0 %vm205_vm3, %v5040_v9 }
0x14b8   :  { %4696 = vmatpush3.bf16.msra.mxu0 %v5073_v21  ;;  %4381 = vmatprep.mubr.msk.f32.mxu0 %vm4870_vm2, %v4869_v1 }
0x14b9   :  { %4697 = vmatprep.subr.bf16.mxu0 %v4871_v6 }
0x14bc   :  { %4699 = vmatpush3.bf16.msra.mxu0 %v5083_v24 }
0x14bd   :  { %4700 = vmatprep.subr.bf16.mxu0 %v4871_v6 }
0x14c0   :  { %4702 = vmatpush3.bf16.msra.mxu0 %v5092_v27 }
0x14c1   :  { %4703 = vmatprep.subr.bf16.mxu0 %v4871_v6 }
0x14c4   :  { %4705 = vmatpush3.bf16.msra.mxu0 %v5102_v30 }
0x14c5   :  { %4718 = vmatprep.subr.bf16.mxu0 %v4871_v6 }
0x1586   :  { %v2111_v15 = vpop.f32.mrb[28].mxu0 }
0x1587   :  { %v4350_v16 = vpop.f32.mrb[29].mxu0  ;;  %v2112_v36 = vadd.f32 %v5445_v35, %v2111_v15 }
0x158a   :  { %v2188_v18 = vpop.f32.mrb[30].mxu0 }
0x158b   :  { %v2189_v20 = vadd.f32 %v5409_v17, %v2188_v18  ;;  %v4357_v22 = vpop.f32.mrb[31].mxu0 }
0x158d   :  { %v2192_v23 = vmax.f32 %v2189_v20, 0.0 }
0x158f   :  { %4363 = vmatmul.mubr.msk.f32.vlgmr.msra.gmra.mrb[20].mxu1 %vm205_vm3, %v2192_v23 }
0x1590   :  { %4388 = vmatprep.mubr.msk.f32.mxu1 %vm4870_vm2, %v4869_v1  ;;  %4708 = vmatpush3.bf16.msra.mxu1 %v5438_v34 }
0x1591   :  { %4709 = vmatprep.subr.bf16.mxu1 %v4871_v6 }
0x1662   :  { %v2268_v14 = vpop.f32.mrb[20].mxu1 }
0x1663   :  { %v2269_v25 = vadd.f32 %v5418_v13, %v2268_v14  ;;  %v4364_v26 = vpop.f32.mrb[21].mxu1 }
0x1665   :  { %4814 = vtanh.f32 %v2269_v25 }
0x1666   :  { %4816 = vtanh.f32 %v2112_v36 }
0x166f   :  { %v4815_v29 = vpop.eup %4814 }
0x1670   :  { %v2273_v33 = vmul.f32 %v4815_v29, %v5424_v28  ;;  %v4817_v37 = vpop.eup %4816 }
0x1671   :  { %v2348_v43 = vmul.f32 %v4817_v37, %v5451_v38  ;;  %v2352_v59 = vmul.f32 %v4817_v37, %v4817_v37 }
0x1672   :  { %4382 = vmatmul.mubr.msk.f32.vlgmr.msra.gmra.mrb[32].mxu0 %vm362_vm5, %v2273_v33 }
0x1673   :  { %4720 = vmatpush3.bf16.msra.mxu0 %v5402_v12  ;;  %4416 = vmatprep.mubr.msk.f32.mxu0 %vm4870_vm2, %v4869_v1  ;;  %v5464_v46 = vadd.f32 %v2348_v43, %v5349_v57 }
0x1674   :  { %4733 = vmatprep.subr.bf16.mxu0 %v4871_v6 }
0x1745   :  { %v2343_v39 = vpop.f32.mrb[32].mxu0 }
0x1746   :  { %v2350_v40 = vmul.f32 %v5451_v38, %v2343_v39  ;;  %v4383_v41 = vpop.f32.mrb[33].mxu0 }
0x1748   :  { %v5456_v44 = vadd.f32 %v2350_v40, %v5040_v9  ;;  %v5476_v9 = vld [vmem:[%s5646_s12] ss:$0 sm:$0xff] }
0x174a   :  { %4389 = vmatmul.mubr.msk.f32.vlgmr.msra.gmra.mrb[22].mxu1 %vm205_vm3, %v5456_v44 }
0x174b   :  { %4711 = vmatpush3.bf16.msra.mxu1 %v5338_v54  ;;  %4395 = vmatprep.mubr.msk.f32.mxu1 %vm4870_vm2, %v4869_v1 }
0x174c   :  { %4712 = vmatprep.subr.bf16.mxu1 %v4871_v6 }
0x174e   :  { %4396 = vmatmul.mubr.msk.f32.vlgmr.msra.gmra.mrb[24].mxu1 %vm205_vm3, %v5464_v46 }
0x174f   :  { %4714 = vmatpush3.bf16.msra.mxu1 %v5361_v60  ;;  %4402 = vmatprep.mubr.msk.f32.mxu1 %vm4870_vm2, %v4869_v1 }
0x1750   :  { %4715 = vmatprep.subr.bf16.mxu1 %v4871_v6 }
0x181d   :  { %v2429_v47 = vpop.f32.mrb[22].mxu1 }
0x181e   :  { %v2430_v48 = vadd.f32 %v5476_v9, %v2429_v47  ;;  %v4390_v49 = vpop.f32.mrb[23].mxu1 }
0x1820   :  { %2434 = vst.msk [vmem:[%s5659_s25] sm:$0x3] %vm2433_vm6, %v2430_v48 }
0x1821   :  { %v2504_v50 = vpop.f32.mrb[24].mxu1 }
0x1822   :  { %v2505_v51 = vadd.f32 %v5368_v62, %v2504_v50  ;;  %v4397_v52 = vpop.f32.mrb[25].mxu1 }
0x1824   :  { %v2508_v45 = vmax.f32 %v2505_v51, 0.0 }
0x1826   :  { %4403 = vmatmul.mubr.msk.f32.vlgmr.msra.gmra.mrb[26].mxu1 %vm205_vm3, %v2508_v45 }
0x1827   :  { %4717 = vmatpush3.bf16.msra.mxu1 %v5377_v7  ;;  %4409 = vmatprep.mubr.msk.f32.mxu1 %vm4870_vm2, %v4869_v1 }
0x1828   :  { %4721 = vmatprep.subr.bf16.mxu1 %v4871_v6 }
0x182a   :  { %4410 = vmatmul.mubr.msk.f32.vlgmr.msra.gmra.mrb[28].mxu1 %vm205_vm3, %v5456_v44 }
0x182b   :  { %4723 = vmatpush3.bf16.msra.mxu1 %v5073_v21  ;;  %4435 = vmatprep.mubr.msk.f32.mxu1 %vm4870_vm2, %v4869_v1 }
0x182c   :  { %4724 = vmatprep.subr.bf16.mxu1 %v4871_v6 }
0x182f   :  { %4726 = vmatpush3.bf16.msra.mxu1 %v5083_v24 }
0x1830   :  { %4727 = vmatprep.subr.bf16.mxu1 %v4871_v6 }
0x1833   :  { %4729 = vmatpush3.bf16.msra.mxu1 %v5092_v27 }
0x1834   :  { %4730 = vmatprep.subr.bf16.mxu1 %v4871_v6 }
0x1837   :  { %4732 = vmatpush3.bf16.msra.mxu1 %v5102_v30 }
0x1838   :  { %4745 = vmatprep.subr.bf16.mxu1 %v4871_v6 }
0x18f9   :  { %v2578_v61 = vpop.f32.mrb[26].mxu1 }
0x18fa   :  { %v2579_v53 = vadd.f32 %v5445_v35, %v2578_v61  ;;  %v4404_v55 = vpop.f32.mrb[27].mxu1 }
0x18fc   :  { %4818 = vtanh.f32 %v2579_v53 }
0x18fd   :  { %v2649_v56 = vpop.f32.mrb[28].mxu1 }
0x18fe   :  { %v2650_v19 = vadd.f32 %v5409_v17, %v2649_v56  ;;  %v4411_v42 = vpop.f32.mrb[29].mxu1 }
0x1900   :  { %v2653_v57 = vmax.f32 %v2650_v19, 0.0 }
0x1902   :  { %4417 = vmatmul.mubr.msk.f32.vlgmr.msra.gmra.mrb[34].mxu0 %vm205_vm3, %v2653_v57 }
0x1903   :  { %4735 = vmatpush3.bf16.msra.mxu0 %v5438_v34  ;;  %4442 = vmatprep.mubr.msk.f32.mxu0 %vm4870_vm2, %v4869_v1 }
0x1904   :  { %4736 = vmatprep.subr.bf16.mxu0 %v4871_v6 }
0x1906   :  { %v4819_v58 = vpop.eup %4818 }
0x1907   :  { %v2806_v5 = vmul.f32 %v4819_v58, %v4819_v58  ;;  %v2802_v16 = vmul.f32 %v4819_v58, %v5451_v38 }
0x1909   :  { %v2807_v63 = vadd.f32 %v2806_v5, %v2352_v59  ;;  %v2803_v20 = vadd.f32 %v2802_v16, %v5464_v46 }
0x19d5   :  { %v2723_v0 = vpop.f32.mrb[34].mxu0 }
0x19d6   :  { %v2724_v2 = vadd.f32 %v5418_v13, %v2723_v0  ;;  %v4418_v3 = vpop.f32.mrb[35].mxu0 }
0x19d8   :  { %4820 = vtanh.f32 %v2724_v2 }
0x19e2   :  { %v4821_v4 = vpop.eup %4820 }
0x19e3   :  { %v2728_v8 = vmul.f32 %v4821_v4, %v5424_v28 }
0x19e5   :  { %4436 = vmatmul.mubr.msk.f32.vlgmr.msra.gmra.mrb[30].mxu1 %vm362_vm5, %v2728_v8 }
0x19e6   :  { %4747 = vmatpush3.bf16.msra.mxu1 %v5402_v12  ;;  %4470 = vmatprep.mubr.msk.f32.mxu1 %vm4870_vm2, %v4869_v1 }
0x19e7   :  { %4760 = vmatprep.subr.bf16.mxu1 %v4871_v6 }
0x1ab8   :  { %v2798_v10 = vpop.f32.mrb[30].mxu1 }
0x1ab9   :  { %v2804_v11 = vmul.f32 %v2798_v10, %v5451_v38  ;;  %v4437_v15 = vpop.f32.mrb[31].mxu1 }
0x1aba   :  { %v3793_v15 = vstv %s3792_s21 }
0x1abb   :  { %v2805_v18 = vadd.f32 %v2804_v11, %v5456_v44 }
0x1abd   :  { %4443 = vmatmul.mubr.msk.f32.vlgmr.msra.gmra.mrb[36].mxu0 %vm205_vm3, %v2805_v18 }
0x1abe   :  { %4738 = vmatpush3.bf16.msra.mxu0 %v5338_v54  ;;  %4449 = vmatprep.mubr.msk.f32.mxu0 %vm4870_vm2, %v4869_v1 }
0x1abf   :  { %4739 = vmatprep.subr.bf16.mxu0 %v4871_v6 }
0x1ac1   :  { %4450 = vmatmul.mubr.msk.f32.vlgmr.msra.gmra.mrb[38].mxu0 %vm205_vm3, %v2803_v20 }
0x1ac2   :  { %4741 = vmatpush3.bf16.msra.mxu0 %v5361_v60  ;;  %4456 = vmatprep.mubr.msk.f32.mxu0 %vm4870_vm2, %v4869_v1 }
0x1ac3   :  { %4742 = vmatprep.subr.bf16.mxu0 %v4871_v6 }
0x1b90   :  { %v2877_v22 = vpop.f32.mrb[36].mxu0 }
0x1b91   :  { %v2878_v23 = vadd.f32 %v5476_v9, %v2877_v22  ;;  %v4444_v14 = vpop.f32.mrb[37].mxu0 }
0x1b93   :  { %3873 = vst.msk [vmem:[%s5659_s25 + $0x2] sm:$0x3] %vm2433_vm6, %v2878_v23 }
0x1b94   :  { %v2952_v25 = vpop.f32.mrb[38].mxu0 }
0x1b95   :  { %v2953_v26 = vadd.f32 %v5368_v62, %v2952_v25  ;;  %v4451_v29 = vpop.f32.mrb[39].mxu0 }
0x1b97   :  { %v2956_v33 = vmax.f32 %v2953_v26, 0.0 }
0x1b99   :  { %4457 = vmatmul.mubr.msk.f32.vlgmr.msra.gmra.mrb[40].mxu0 %vm205_vm3, %v2956_v33 }
0x1b9a   :  { %4744 = vmatpush3.bf16.msra.mxu0 %v5377_v7  ;;  %4463 = vmatprep.mubr.msk.f32.mxu0 %vm4870_vm2, %v4869_v1 }
0x1b9b   :  { %4748 = vmatprep.subr.bf16.mxu0 %v4871_v6 }
0x1b9d   :  { %4464 = vmatmul.mubr.msk.f32.vlgmr.msra.gmra.mrb[42].mxu0 %vm205_vm3, %v2805_v18 }
0x1b9e   :  { %4750 = vmatpush3.bf16.msra.mxu0 %v5073_v21  ;;  %4489 = vmatprep.mubr.msk.f32.mxu0 %vm4870_vm2, %v4869_v1 }
0x1b9f   :  { %4751 = vmatprep.subr.bf16.mxu0 %v4871_v6 }
0x1ba2   :  { %4753 = vmatpush3.bf16.msra.mxu0 %v5083_v24 }
0x1ba3   :  { %4754 = vmatprep.subr.bf16.mxu0 %v4871_v6 }
0x1ba6   :  { %4756 = vmatpush3.bf16.msra.mxu0 %v5092_v27 }
0x1ba7   :  { %4757 = vmatprep.subr.bf16.mxu0 %v4871_v6 }
0x1baa   :  { %4759 = vmatpush3.bf16.msra.mxu0 %v5102_v30 }
0x1bab   :  { %4772 = vmatprep.subr.bf16.mxu0 %v4871_v6 }
0x1c6c   :  { %v3026_v31 = vpop.f32.mrb[40].mxu0 }
0x1c6d   :  { %v3027_v32 = vadd.f32 %v5445_v35, %v3026_v31  ;;  %v4458_v36 = vpop.f32.mrb[41].mxu0 }
0x1c6f   :  { %4822 = vtanh.f32 %v3027_v32 }
0x1c70   :  { %v3097_v37 = vpop.f32.mrb[42].mxu0 }
0x1c71   :  { %v3098_v39 = vadd.f32 %v5409_v17, %v3097_v37  ;;  %v4465_v40 = vpop.f32.mrb[43].mxu0 }
0x1c73   :  { %v3101_v41 = vmax.f32 %v3098_v39, 0.0 }
0x1c75   :  { %4471 = vmatmul.mubr.msk.f32.vlgmr.msra.gmra.mrb[32].mxu1 %vm205_vm3, %v3101_v41 }
0x1c76   :  { %4762 = vmatpush3.bf16.msra.mxu1 %v5438_v34  ;;  %4496 = vmatprep.mubr.msk.f32.mxu1 %vm4870_vm2, %v4869_v1 }
0x1c77   :  { %4763 = vmatprep.subr.bf16.mxu1 %v4871_v6 }
0x1c79   :  { %v4823_v43 = vpop.eup %4822 }
0x1c7a   :  { %v3254_v44 = vmul.f32 %v4823_v43, %v4823_v43  ;;  %v3250_v53 = vmul.f32 %v4823_v43, %v5451_v38 }
0x1c7c   :  { %v3255_v46 = vadd.f32 %v3254_v44, %v2807_v63 }
0x1d48   :  { %v3171_v47 = vpop.f32.mrb[32].mxu1 }
0x1d49   :  { %v3172_v48 = vadd.f32 %v5418_v13, %v3171_v47  ;;  %v4472_v49 = vpop.f32.mrb[33].mxu1 }
0x1d4b   :  { %4824 = vtanh.f32 %v3172_v48 }
0x1d55   :  { %v4825_v50 = vpop.eup %4824 }
0x1d56   :  { %v3176_v51 = vmul.f32 %v4825_v50, %v5424_v28 }
0x1d58   :  { %4490 = vmatmul.mubr.msk.f32.vlgmr.msra.gmra.mrb[44].mxu0 %vm362_vm5, %v3176_v51 }
0x1d59   :  { %4774 = vmatpush3.bf16.msra.mxu0 %v5402_v12  ;;  %4524 = vmatprep.mubr.msk.f32.mxu0 %vm4870_vm2, %v4869_v1  ;;  %v3251_v12 = vadd.f32 %v3250_v53, %v2803_v20 }
0x1d5a   :  { %4787 = vmatprep.subr.bf16.mxu0 %v4871_v6 }
0x1e2b   :  { %v3246_v52 = vpop.f32.mrb[44].mxu0 }
0x1e2c   :  { %v3252_v45 = vmul.f32 %v3246_v52, %v5451_v38  ;;  %v4491_v61 = vpop.f32.mrb[45].mxu0 }
0x1e2e   :  { %v5567_v55 = vadd.f32 %v3252_v45, %v2805_v18 }
0x1e30   :  { %4497 = vmatmul.mubr.msk.f32.vlgmr.msra.gmra.mrb[34].mxu1 %vm205_vm3, %v5567_v55 }
0x1e31   :  { %4765 = vmatpush3.bf16.msra.mxu1 %v5338_v54  ;;  %4503 = vmatprep.mubr.msk.f32.mxu1 %vm4870_vm2, %v4869_v1 }
0x1e32   :  { %4766 = vmatprep.subr.bf16.mxu1 %v4871_v6 }
0x1e34   :  { %4504 = vmatmul.mubr.msk.f32.vlgmr.msra.gmra.mrb[36].mxu1 %vm205_vm3, %v3251_v12 }
0x1e35   :  { %4768 = vmatpush3.bf16.msra.mxu1 %v5361_v60  ;;  %4510 = vmatprep.mubr.msk.f32.mxu1 %vm4870_vm2, %v4869_v1 }
0x1e36   :  { %4769 = vmatprep.subr.bf16.mxu1 %v4871_v6 }
0x1f03   :  { %v3325_v56 = vpop.f32.mrb[34].mxu1 }
0x1f04   :  { %v3326_v19 = vadd.f32 %v5476_v9, %v3325_v56  ;;  %v4498_v42 = vpop.f32.mrb[35].mxu1 }
0x1f06   :  { %3880 = vst.msk [vmem:[%s5659_s25 + $0x4] sm:$0x3] %vm2433_vm6, %v3326_v19 }
0x1f07   :  { %v3400_v54 = vpop.f32.mrb[36].mxu1 }
0x1f08   :  { %v3401_v57 = vadd.f32 %v5368_v62, %v3400_v54  ;;  %v4505_v58 = vpop.f32.mrb[37].mxu1 }
0x1f0a   :  { %v3404_v59 = vmax.f32 %v3401_v57, 0.0 }
0x1f0c   :  { %4511 = vmatmul.mubr.msk.f32.vlgmr.msra.gmra.mrb[38].mxu1 %vm205_vm3, %v3404_v59 }
0x1f0d   :  { %4771 = vmatpush3.bf16.msra.mxu1 %v5377_v7  ;;  %4517 = vmatprep.mubr.msk.f32.mxu1 %vm4870_vm2, %v4869_v1 }
0x1f0e   :  { %4775 = vmatprep.subr.bf16.mxu1 %v4871_v6 }
0x1f10   :  { %4518 = vmatmul.mubr.msk.f32.vlgmr.msra.gmra.mrb[40].mxu1 %vm205_vm3, %v5567_v55 }
0x1f11   :  { %4777 = vmatpush3.bf16.msra.mxu1 %v5073_v21  ;;  %4543 = vmatprep.mubr.msk.f32.mxu1 %vm4870_vm2, %v4869_v1 }
0x1f12   :  { %4778 = vmatprep.subr.bf16.mxu1 %v4871_v6 }
0x1f15   :  { %4780 = vmatpush3.bf16.msra.mxu1 %v5083_v24 }
0x1f16   :  { %4781 = vmatprep.subr.bf16.mxu1 %v4871_v6 }
0x1f19   :  { %4783 = vmatpush3.bf16.msra.mxu1 %v5092_v27 }
0x1f1a   :  { %4784 = vmatprep.subr.bf16.mxu1 %v4871_v6 }
0x1f1d   :  { %4786 = vmatpush3.bf16.msra.mxu1 %v5102_v30 }
0x1fdf   :  { %v3474_v60 = vpop.f32.mrb[38].mxu1 }
0x1fe0   :  { %v3475_v62 = vadd.f32 %v5445_v35, %v3474_v60  ;;  %v4512_v7 = vpop.f32.mrb[39].mxu1 }
0x1fe2   :  { %4826 = vtanh.f32 %v3475_v62 }
0x1fe3   :  { %v3545_v21 = vpop.f32.mrb[40].mxu1 }
0x1fe4   :  { %v3546_v5 = vadd.f32 %v5409_v17, %v3545_v21  ;;  %v4519_v63 = vpop.f32.mrb[41].mxu1 }
0x1fe6   :  { %v3549_v0 = vmax.f32 %v3546_v5, 0.0 }
0x1fe8   :  { %4525 = vmatmul.mubr.msk.f32.vlgmr.msra.gmra.mrb[46].mxu0 %vm205_vm3, %v3549_v0 }
0x1fe9   :  { %4789 = vmatpush3.bf16.msra.mxu0 %v5438_v34  ;;  %4550 = vmatprep.mubr.msk.f32.mxu0 %vm4870_vm2, %v4869_v1  ;;  %vm3795_vm2 = vcmask 0  }
0x1fec   :  { %v4827_v6 = vpop.eup %4826 }
0x1fed   :  { %v3700_v24 = vmul.f32 %v4827_v6, %v4827_v6 }
0x1fef   :  { %v3701_v27 = vadd.f32 %v3700_v24, %v3255_v46 }
0x1ff1   :  { %v3778_v30 = vsel %vm3777_vm7, %v3701_v27, 0.0 }
0x1ff2   :  { %3779 = vadd.xlane.f32.xlu1 %v3778_v30 }
0x207f   :  { %v3780_v35 = vpop.xlane.xlu1 %3779 }
0x2080   :  { %v3781_v2 = vrot.slane %v3780_v35, 4 }
0x2082   :  { %v3782_v3 = vadd.f32 %v3781_v2, %v3780_v35 }
0x2084   :  { %v3783_v4 = vrot.slane %v3782_v3, 2 }
0x2086   :  { %v3784_v17 = vadd.f32 %v3783_v4, %v3782_v3 }
0x2088   :  { %v3785_v8 = vrot.slane %v3784_v17, 1 }
0x208a   :  { %v3786_v10 = vadd.f32 %v3785_v8, %v3784_v17 }
0x208c   :  { %4790 = vpush %v3786_v10 }
0x20bb   :  { %v3619_v1 = vpop.f32.mrb[46].mxu0 }
0x20bc   :  { %v3620_v34 = vadd.f32 %v5418_v13, %v3619_v1  ;;  %v4526_v11 = vpop.f32.mrb[47].mxu0 }
0x20bd   :  { %s4791_s13 = spop %4790 }
0x20be   :  { %4828 = vtanh.f32 %v3620_v34  ;;  %v3788_v16 = vstv %s4791_s13 }
0x20bf   :  { %v3794_v18 = vmul.f32 %v3793_v15, %v3788_v16 }
0x20c1   :  { %3796 = vst.msk [vmem:[#allocation6] sm:$0x1] %vm3795_vm2, %v3794_v18 }
0x20c8   :  { %v4829_v20 = vpop.eup %4828 }
0x20c9   :  { %v3624_v22 = vmul.f32 %v4829_v20, %v5424_v28 }
0x20cb   :  { %4544 = vmatmul.mubr.msk.f32.vlgmr.msra.gmra.mrb[42].mxu1 %vm362_vm5, %v3624_v22 }
0x219e   :  { %v3694_v23 = vpop.f32.mrb[42].mxu1 }
0x219f   :  { %v3698_v14 = vmul.f32 %v3694_v23, %v5451_v38  ;;  %v4545_v25 = vpop.f32.mrb[43].mxu1 }
0x21a1   :  { %v3699_v26 = vadd.f32 %v3698_v14, %v5567_v55 }
0x21a3   :  { %4551 = vmatmul.mubr.msk.f32.vlgmr.msra.gmra.mrb[48].mxu0 %vm205_vm3, %v3699_v26 }
0x21a4   :  { %4853 = shalt.err (!%p4850_p9)
}
0x21a5   :  { %s4854_s8 = scalar_lea.hbm %s5660_s26, 16 }
0x21a6   :  { %p4855_p10 = scmp.ne.s32.totalorder %s5660_s26, %s4854_s8  ;;  %p4858_p11 = scmp.lt.u32.totalorder %s4854_s8, %s5660_s26 }
0x21a8   :  { %p4860_p12 = pnand %p4858_p11, %p4855_p10 }
0x21aa   :  { %4863 = shalt.err (!%p4860_p12)
}
0x21ab   :  { %3808 = dma.vmem_to_hbm [thread:$0]  %s3806_s6, 16, %s5660_s26, [#allocation4]  }
0x2276   :  { %v3771_v13 = vpop.f32.mrb[48].mxu0 }
0x2277   :  { %v3772_v28 = vadd.f32 %v5476_v9, %v3771_v13  ;;  %v4552_v38 = vpop.f32.mrb[49].mxu0 }
0x2279   :  { %3887 = vst.msk [vmem:[%s5659_s25 + $0x6] sm:$0x3] %vm2433_vm6, %v3772_v28 }
0x227a   :  { %4866 = dma.done.wait [#allocation4], 16  }
0x227b   :  { %4867 = vsyncadd [#allocation4], 4294967280 }
0x227c   :  { %3814 = vsyncpa [#allocation4], 1 }
0x227d   :  { %3815 = vsyncpa [#allocation5], 1 }

</bundles_post_ra>
